<compile_context>
chip_gen: v5e
topology: v5e:2x2
jax: 0.10.0
libtpu: 0.0.40
codegen_flags: <defaults>
</compile_context>

<pallas_src>
import functools

import jax
import jax.numpy as jnp
from jax.experimental import pallas as pl
from jax.experimental.pallas import tpu as pltpu


# --------------------------------------------------------------------------
# model config (small, consistent with the module's constructor arguments)
# --------------------------------------------------------------------------
B = 16           # total batch
TB = 8           # batch tile per grid step (multiple of 8 -> f32 sublane tile)
N_OBJ = 10       # number of candidate objects per sample
C_IN = 32        # img_feat dim (c_in)
C_OBJ = 16       # object embedding dim (c_obj)
N_PAIR = 8       # number of action pairs (n_pair)
C_IMG_EN = [64, 32]
C_FUSION = [32, 16]

LANE = 128                            # lane width of every packed slab
H1, H2 = C_IMG_EN[0], C_IMG_EN[1]     # 64, 32

# row layout of the packed weight slab (all offsets are multiples of 8)
_W1_R0, _W1_R1 = 0, C_IN                       # fused layer 1      (32 rows)
_W2_R0, _W2_R1 = _W1_R1, _W1_R1 + LANE         # block-diag layer 2 (128 rows)
_W3_R0, _W3_R1 = _W2_R1, _W2_R1 + LANE         # matcher L3 + fusion L1
_W4_R0, _W4_R1 = _W3_R1, _W3_R1 + C_OBJ        # fusion L1 (obj part, argmax path)
_W5_R0, _W5_R1 = _W4_R1, _W4_R1 + LANE         # fusion L2
_W6_R0, _W6_R1 = _W5_R1, _W5_R1 + LANE         # fusion L3
W_ROWS = _W6_R1                                # 560

# lane layout of the merged (B, 128) output
SEL_OFF = 16                     # selected_obj_vec at lanes [16:32]
PAIR_OFF = 32                    # pair_choice     at lanes [32:40]


def _log_softmax(x):
    m = jnp.max(x, axis=-1, keepdims=True)
    s = x - m
    return s - jnp.log(jnp.sum(jnp.exp(s), axis=-1, keepdims=True))


# --------------------------------------------------------------------------
# kernel (one batch tile per grid step; weight/bias slabs resident)
# --------------------------------------------------------------------------
def _decoder_kernel(objects_ref, img_ref, w_ref, b_ref, *rest, use_target):
    if use_target:
        target_ref, out_ref = rest
    else:
        (out_ref,) = rest

    f32 = jnp.float32
    bf16 = jnp.bfloat16
    relu = lambda v: jnp.maximum(v, 0.0)

    objects = objects_ref[...]                     # (TB, N_OBJ, C_OBJ) f32
    img = img_ref[...]                             # (TB, C_IN) f32
    tb, n_obj, c_obj = objects.shape

    def bias(k):
        # bias rows pre-replicated host-side to TB sublanes -> plain vreg add
        return b_ref[k * tb:(k + 1) * tb, :]

    def mm(x, r0, r1):
        # bf16 operands on the MXU, f32 accumulation
        return jnp.dot(x.astype(bf16), w_ref[r0:r1, :],
                       preferred_element_type=f32)

    # ---- fused trunk (activations kept 128-lane dense, zero padded) ----
    # t1 lanes [0:64]  = matcher layer 1,  lanes [64:128] = img_en layer 1
    t1 = relu(mm(img, _W1_R0, _W1_R1) + bias(0))
    # t2 lanes [0:32]  = matcher layer 2,  lanes [32:64]  = img_en layer 2,
    #    lanes [64:128] = 0 (block-diag W2, zero bias there)
    t2 = relu(mm(t1, _W2_R0, _W2_R1) + bias(1))

    if use_target:
        # Teacher forcing: ride the fusion-L1 object contribution on the W3
        # matmul.  Lanes [64:80] of t2 are guaranteed zero, so a full-vreg add
        # places the target there; W3 rows 64:80 hold fw1_obj.
        target = target_ref[...]                   # (TB, C_OBJ) f32
        tpad = jnp.concatenate(
            [jnp.zeros((tb, H1), f32), target,
             jnp.zeros((tb, LANE - H1 - C_OBJ), f32)], axis=-1)
        t2 = t2 + tpad

    # t3 lanes [0:16]  = matcher layer 3 (pre-ReLU obj_vec)
    #    lanes [16:48] = fusion layer 1 pre-activation (image part + fb1,
    #                    plus the object part in the teacher-forced variant)
    t3 = mm(t2, _W3_R0, _W3_R1) + bias(2)

    # ---------------- ObjectMatcher ----------------
    obj_vec = relu(t3[:, :C_OBJ])                                  # (TB, C_OBJ)
    # similarity = objects.bmm(obj_vec.unsqueeze(2)).squeeze()  -> (TB, N_OBJ)
    sim = jnp.sum(objects * obj_vec[:, None, :], axis=2)
    obj_choice = _log_softmax(sim)

    if use_target:
        selected = target
        g = relu(t3)          # fusion L1 already includes the object part
    else:
        # torch.argmax (first-max tie break) + gather, branch-free:
        n_iota = jax.lax.broadcasted_iota(jnp.int32, (tb, n_obj), 1)
        max_sim = jnp.max(sim, axis=1, keepdims=True)
        idx = jnp.min(jnp.where(sim == max_sim, n_iota, n_obj),
                      axis=1, keepdims=True)                       # (TB, 1)
        iota3 = jax.lax.broadcasted_iota(jnp.int32, (tb, n_obj, c_obj), 1)
        mask3 = (iota3 == idx[:, :, None]).astype(f32)             # (TB,N,C)
        selected = jnp.sum(objects * mask3, axis=1)                # (TB, C_OBJ)

        # fusion L1, object part: lanes [16:48] (lanes [0:16] of W4 are zero)
        u = mm(selected, _W4_R0, _W4_R1)
        g = relu(t3 + u)

    # ---------------- ActionClassifier tail ----------------
    # g2 lanes [0:16] = fusion layer 2
    g2 = relu(mm(g, _W5_R0, _W5_R1) + bias(3))
    # lg lanes [0:8]  = fusion layer 3 (logits)
    lg = relu(mm(g2, _W6_R0, _W6_R1) + bias(4))
    pair_choice = _log_softmax(lg[:, :N_PAIR])

    # ---- single lane-dense (TB, 128) store: [obj_choice | sel | pair | 0] ----
    out_ref[...] = jnp.concatenate(
        [obj_choice,
         jnp.zeros((tb, SEL_OFF - n_obj), f32),
         selected,
         pair_choice,
         jnp.zeros((tb, LANE - PAIR_OFF - N_PAIR), f32)],
        axis=-1)


# --------------------------------------------------------------------------
# parameter construction / packing (host side, done once)
# --------------------------------------------------------------------------
def init_params(key):
    """Deterministic synthetic parameters: weights (in,out), biases (out,)."""
    def lin(k, cin, cout):
        kw, kb = jax.random.split(k)
        w = jax.random.normal(kw, (cin, cout), jnp.float32) / jnp.sqrt(cin)
        b = jax.random.normal(kb, (cout,), jnp.float32) * 0.01
        return w, b

    ks = jax.random.split(key, 8)
    p = {}
    # matcher.predictor: C_IN -> 64 -> 32 -> C_OBJ
    p["mw1"], p["mb1"] = lin(ks[0], C_IN, H1)
    p["mw2"], p["mb2"] = lin(ks[1], H1, H2)
    p["mw3"], p["mb3"] = lin(ks[2], H2, C_OBJ)
    # classifier.img_en: C_IN -> 64 -> 32
    p["ew1"], p["eb1"] = lin(ks[3], C_IN, H1)
    p["ew2"], p["eb2"] = lin(ks[4], H1, H2)
    # classifier.fusion: (32 + C_OBJ) -> 32 -> 16 -> N_PAIR
    p["fw1"], p["fb1"] = lin(ks[5], H2 + C_OBJ, C_FUSION[0])
    p["fw2"], p["fb2"] = lin(ks[6], C_FUSION[0], C_FUSION[1])
    p["fw3"], p["fb3"] = lin(ks[7], C_FUSION[1], N_PAIR)
    return p


def pack_params(p, tb):
    """Pack weights into one bf16 (560,128) slab and biases into an f32
    (5*tb,128) slab with each bias row pre-replicated to tb sublanes."""
    f32 = jnp.float32
    fw1_img = p["fw1"][:H2, :]          # applies to img_en output
    fw1_obj = p["fw1"][H2:, :]          # applies to selected object vector

    w = jnp.zeros((W_ROWS, LANE), f32)
    # fused layer 1: img -> [matcher_h1 | img_en_e1]
    w = w.at[_W1_R0:_W1_R0 + C_IN, 0:H1].set(p["mw1"])
    w = w.at[_W1_R0:_W1_R0 + C_IN, H1:2 * H1].set(p["ew1"])
    # block-diagonal layer 2: [h1 | e1] -> [h2 | e2 | 0]
    w = w.at[_W2_R0:_W2_R0 + H1, 0:H2].set(p["mw2"])
    w = w.at[_W2_R0 + H1:_W2_R0 + 2 * H1, H2:2 * H2].set(p["ew2"])
    # block layer 3: [h2 | e2 | tgt?] -> [obj_vec_pre | fusion1_pre | 0]
    w = w.at[_W3_R0:_W3_R0 + H2, 0:C_OBJ].set(p["mw3"])
    w = w.at[_W3_R0 + H2:_W3_R0 + 2 * H2, C_OBJ:C_OBJ + C_FUSION[0]].set(fw1_img)
    # teacher-forced fusion L1 object part rides rows 64:80 of the W3 block
    w = w.at[_W3_R0 + H1:_W3_R0 + H1 + C_OBJ,
             C_OBJ:C_OBJ + C_FUSION[0]].set(fw1_obj)
    # fusion layer 1, object part (argmax path): selected -> lanes [16:48]
    w = w.at[_W4_R0:_W4_R0 + C_OBJ, C_OBJ:C_OBJ + C_FUSION[0]].set(fw1_obj)
    # fusion layer 2: g lanes [16:48] -> lanes [0:16]
    w = w.at[_W5_R0 + C_OBJ:_W5_R0 + C_OBJ + C_FUSION[0],
             0:C_FUSION[1]].set(p["fw2"])
    # fusion layer 3: g2 lanes [0:16] -> lanes [0:8]
    w = w.at[_W6_R0:_W6_R0 + C_FUSION[1], 0:N_PAIR].set(p["fw3"])
    w = w.astype(jnp.bfloat16)

    brows = jnp.zeros((5, LANE), f32)
    brows = brows.at[0, 0:H1].set(p["mb1"]).at[0, H1:2 * H1].set(p["eb1"])
    brows = brows.at[1, 0:H2].set(p["mb2"]).at[1, H2:2 * H2].set(p["eb2"])
    brows = brows.at[2, 0:C_OBJ].set(p["mb3"])
    brows = brows.at[2, C_OBJ:C_OBJ + C_FUSION[0]].set(p["fb1"])
    brows = brows.at[3, 0:C_FUSION[1]].set(p["fb2"])
    brows = brows.at[4, 0:N_PAIR].set(p["fb3"])
    b = jnp.repeat(brows, tb, axis=0)       # (5*tb, 128) f32
    return w, b


# --------------------------------------------------------------------------
# wrapper
# --------------------------------------------------------------------------
def transformation_decoder(objects, img_feat, w_slab, b_slab, tb,
                           output_obj_vec=False, obj_target_vec=None):
    """Pallas-backed forward.  Returns (obj_choice, pair_choice) or
    (obj_choice, selected_obj_vec, pair_choice)."""
    bsz = objects.shape[0]
    assert bsz % tb == 0, "batch must be a multiple of the batch tile"
    n_tiles = bsz // tb
    use_target = obj_target_vec is not None

    in_specs = [
        pl.BlockSpec((tb, N_OBJ, C_OBJ), lambda i: (i, 0, 0)),
        pl.BlockSpec((tb, C_IN), lambda i: (i, 0)),
        pl.BlockSpec((W_ROWS, LANE), lambda i: (0, 0)),     # weights resident
        pl.BlockSpec((5 * tb, LANE), lambda i: (0, 0)),     # biases resident
    ]
    inputs = [objects, img_feat, w_slab, b_slab]
    if use_target:
        in_specs.append(pl.BlockSpec((tb, C_OBJ), lambda i: (i, 0)))
        inputs.append(obj_target_vec)

    n_dots = 5 if use_target else 6
    bytes_in = sum(int(x.size) * int(x.dtype.itemsize) for x in inputs)
    cost = pl.CostEstimate(
        flops=2 * bsz * n_dots * LANE * LANE,
        transcendentals=bsz * (N_OBJ + N_PAIR + 2),
        bytes_accessed=bytes_in + bsz * LANE * 4)

    out = pl.pallas_call(
        functools.partial(_decoder_kernel, use_target=use_target),
        out_shape=jax.ShapeDtypeStruct((bsz, LANE), jnp.float32),
        grid=(n_tiles,),
        in_specs=in_specs,
        out_specs=pl.BlockSpec((tb, LANE), lambda i: (i, 0)),
        compiler_params=pltpu.CompilerParams(
            dimension_semantics=("parallel",)),
        cost_estimate=cost,
    )(*inputs)

    obj_choice = out[:, :N_OBJ]
    selected = out[:, SEL_OFF:SEL_OFF + C_OBJ]
    pair_choice = out[:, PAIR_OFF:PAIR_OFF + N_PAIR]
    if output_obj_vec:
        return obj_choice, selected, pair_choice
    return obj_choice, pair_choice


# --------------------------------------------------------------------------
# pure-JAX reference (same FCBlocks assumption, same bf16-at-dot convention)
# --------------------------------------------------------------------------
def reference(objects, img_feat, p, obj_target_vec=None):
    relu = lambda v: jnp.maximum(v, 0.0)
    bf16 = jnp.bfloat16

    def bdot(x, w):
        return jnp.dot(x.astype(bf16), w.astype(bf16),
                       preferred_element_type=jnp.float32)

    h = relu(bdot(img_feat, p["mw1"]) + p["mb1"])
    h = relu(bdot(h, p["mw2"]) + p["mb2"])
    obj_vec = relu(bdot(h, p["mw3"]) + p["mb3"])

    sim = jnp.einsum("bnc,bc->bn", objects, obj_vec)
    obj_choice = jax.nn.log_softmax(sim, axis=1)
    idx = jnp.argmax(sim, axis=1)
    selected = objects[jnp.arange(objects.shape[0]), idx]
    if obj_target_vec is not None:
        selected = obj_target_vec

    e = relu(bdot(img_feat, p["ew1"]) + p["eb1"])
    e = relu(bdot(e, p["ew2"]) + p["eb2"])
    cat = jnp.concatenate([e, selected], axis=1)
    g = relu(bdot(cat, p["fw1"]) + p["fb1"])
    g = relu(bdot(g, p["fw2"]) + p["fb2"])
    logits = relu(bdot(g, p["fw3"]) + p["fb3"])
    pair_choice = jax.nn.log_softmax(logits, axis=1)
    return obj_choice, selected, pair_choice


if __name__ == "__main__":
    key = jax.random.PRNGKey(0)
    k_obj, k_img, k_tgt, k_par = jax.random.split(key, 4)

    objects = jax.random.normal(k_obj, (B, N_OBJ, C_OBJ), jnp.float32)
    img_feat = jax.random.normal(k_img, (B, C_IN), jnp.float32)
    params = init_params(k_par)
    w_slab, b_slab = pack_params(params, TB)

    # ---- path 1: argmax object selection ----
    obj_choice, sel_obj, pair_choice = transformation_decoder(
        objects, img_feat, w_slab, b_slab, tb=TB, output_obj_vec=True)
    jax.block_until_ready((obj_choice, sel_obj, pair_choice))

    r_oc, r_sel, r_pair = reference(objects, img_feat, params)
    assert jnp.allclose(obj_choice, r_oc, atol=2e-3), "obj_choice mismatch"
    assert jnp.allclose(sel_obj, r_sel, atol=2e-3), "selected_obj_vec mismatch"
    assert jnp.allclose(pair_choice, r_pair, atol=2e-3), "pair_choice mismatch"

    # ---- path 2: teacher-forced obj_target_vec ----
    target = jax.random.normal(k_tgt, (B, C_OBJ), jnp.float32)
    oc2, sel2, pair2 = transformation_decoder(
        objects, img_feat, w_slab, b_slab, tb=TB,
        output_obj_vec=True, obj_target_vec=target)
    jax.block_until_ready((oc2, sel2, pair2))

    r_oc2, r_sel2, r_pair2 = reference(objects, img_feat, params,
                                       obj_target_vec=target)
    assert jnp.allclose(oc2, r_oc2, atol=2e-3), "obj_choice (target) mismatch"
    assert jnp.allclose(sel2, r_sel2, atol=2e-3), "target passthrough mismatch"
    assert jnp.allclose(pair2, r_pair2, atol=2e-3), "pair_choice (target) mismatch"

    print("KERNEL_OK")
</pallas_src>

<mosaic_0001>
module attributes {stable_mosaic.version = 11 : i64} {
  func.func @_decoder_kernel(%arg0: i32, %arg1: memref<8x10x16xf32, #tpu.memory_space<vmem>>, %arg2: memref<8x32xf32, #tpu.memory_space<vmem>>, %arg3: memref<560x128xbf16, #tpu.memory_space<vmem>>, %arg4: memref<40x128xf32, #tpu.memory_space<vmem>>, %arg5: memref<8x128xf32, #tpu.memory_space<vmem>>) attributes {dimension_semantics = [#tpu.dimension_semantics<parallel>], iteration_bounds = array<i64: 2>, scalar_prefetch = 0 : i64, scratch_operands = 0 : i64, tpu.core_type = #tpu.core_type<tc>, window_params = [{transform_indices = @transform_0, window_bounds = array<i64: 8, 10, 16>}, {transform_indices = @transform_1, window_bounds = array<i64: 8, 32>}, {pipeline_mode = #tpu.pipeline_mode<synchronous>, transform_indices = @transform_2, window_bounds = array<i64: 560, 128>}, {pipeline_mode = #tpu.pipeline_mode<synchronous>, transform_indices = @transform_3, window_bounds = array<i64: 40, 128>}, {transform_indices = @transform_4, window_bounds = array<i64: 8, 128>}]} {
    %c0 = arith.constant 0 : index
    %c0_0 = arith.constant 0 : index
    %c0_1 = arith.constant 0 : index
    %0 = vector.load %arg1[%c0, %c0_0, %c0_1] : memref<8x10x16xf32, #tpu.memory_space<vmem>>, vector<8x10x16xf32>
    %c0_2 = arith.constant 0 : index
    %c0_3 = arith.constant 0 : index
    %1 = vector.load %arg2[%c0_2, %c0_3] : memref<8x32xf32, #tpu.memory_space<vmem>>, vector<8x32xf32>
    %2 = arith.truncf %1 : vector<8x32xf32> to vector<8x32xbf16>
    %c0_4 = arith.constant 0 : index
    %c0_5 = arith.constant 0 : index
    %3 = vector.load %arg3[%c0_4, %c0_5] : memref<560x128xbf16, #tpu.memory_space<vmem>>, vector<32x128xbf16>
    %cst = arith.constant dense<0.000000e+00> : vector<8x128xf32>
    %4 = tpu.matmul %2, %3, %cst {dimension_numbers = #tpu.dot_dimension_numbers<[1], [0], [0], [1], [0, 0, 1, 1], [], []>} : vector<8x32xbf16>, vector<32x128xbf16>, vector<8x128xf32> -> vector<8x128xf32>
    %c0_6 = arith.constant 0 : index
    %c0_7 = arith.constant 0 : index
    %5 = vector.load %arg4[%c0_6, %c0_7] : memref<40x128xf32, #tpu.memory_space<vmem>>, vector<8x128xf32>
    %6 = arith.addf %4, %5 : vector<8x128xf32>
    %cst_8 = arith.constant 0.000000e+00 : f32
    %7 = vector.broadcast %cst_8 : f32 to vector<8x128xf32>
    %8 = arith.maximumf %6, %7 : vector<8x128xf32>
    %9 = arith.truncf %8 : vector<8x128xf32> to vector<8x128xbf16>
    %c32 = arith.constant 32 : index
    %c0_9 = arith.constant 0 : index
    %10 = vector.load %arg3[%c32, %c0_9] : memref<560x128xbf16, #tpu.memory_space<vmem>>, vector<128x128xbf16>
    %cst_10 = arith.constant dense<0.000000e+00> : vector<8x128xf32>
    %11 = tpu.matmul %9, %10, %cst_10 {dimension_numbers = #tpu.dot_dimension_numbers<[1], [0], [0], [1], [0, 0, 1, 1], [], []>} : vector<8x128xbf16>, vector<128x128xbf16>, vector<8x128xf32> -> vector<8x128xf32>
    %c8 = arith.constant 8 : index
    %c0_11 = arith.constant 0 : index
    %12 = vector.load %arg4[%c8, %c0_11] : memref<40x128xf32, #tpu.memory_space<vmem>>, vector<8x128xf32>
    %13 = arith.addf %11, %12 : vector<8x128xf32>
    %cst_12 = arith.constant 0.000000e+00 : f32
    %14 = vector.broadcast %cst_12 : f32 to vector<8x128xf32>
    %15 = arith.maximumf %13, %14 : vector<8x128xf32>
    %16 = arith.truncf %15 : vector<8x128xf32> to vector<8x128xbf16>
    %c160 = arith.constant 160 : index
    %c0_13 = arith.constant 0 : index
    %17 = vector.load %arg3[%c160, %c0_13] : memref<560x128xbf16, #tpu.memory_space<vmem>>, vector<128x128xbf16>
    %cst_14 = arith.constant dense<0.000000e+00> : vector<8x128xf32>
    %18 = tpu.matmul %16, %17, %cst_14 {dimension_numbers = #tpu.dot_dimension_numbers<[1], [0], [0], [1], [0, 0, 1, 1], [], []>} : vector<8x128xbf16>, vector<128x128xbf16>, vector<8x128xf32> -> vector<8x128xf32>
    %c16 = arith.constant 16 : index
    %c0_15 = arith.constant 0 : index
    %19 = vector.load %arg4[%c16, %c0_15] : memref<40x128xf32, #tpu.memory_space<vmem>>, vector<8x128xf32>
    %20 = arith.addf %18, %19 : vector<8x128xf32>
    %21 = vector.extract_strided_slice %20 {offsets = [0, 0], sizes = [8, 16], strides = [1, 1]} : vector<8x128xf32> to vector<8x16xf32>
    %cst_16 = arith.constant 0.000000e+00 : f32
    %22 = vector.broadcast %cst_16 : f32 to vector<8x16xf32>
    %23 = arith.maximumf %21, %22 : vector<8x16xf32>
    %24 = vector.shape_cast %23 : vector<8x16xf32> to vector<8x1x16xf32>
    %25 = vector.broadcast %24 : vector<8x1x16xf32> to vector<8x10x16xf32>
    %26 = arith.mulf %0, %25 : vector<8x10x16xf32>
    %cst_17 = arith.constant dense<0.000000e+00> : vector<8x10xf32>
    %27 = vector.multi_reduction <add>, %26, %cst_17 [2] : vector<8x10x16xf32> to vector<8x10xf32>
    %cst_18 = arith.constant dense<0xFF800000> : vector<8xf32>
    %28 = vector.multi_reduction <maximumf>, %27, %cst_18 [1] : vector<8x10xf32> to vector<8xf32>
    %29 = vector.shape_cast %28 : vector<8xf32> to vector<8x1xf32>
    %30 = vector.broadcast %29 : vector<8x1xf32> to vector<8x10xf32>
    %31 = arith.subf %27, %30 : vector<8x10xf32>
    %32 = math.exp %31 : vector<8x10xf32>
    %cst_19 = arith.constant dense<0.000000e+00> : vector<8xf32>
    %33 = vector.multi_reduction <add>, %32, %cst_19 [1] : vector<8x10xf32> to vector<8xf32>
    %34 = vector.shape_cast %33 : vector<8xf32> to vector<8x1xf32>
    %35 = math.log %34 : vector<8x1xf32>
    %36 = vector.broadcast %35 : vector<8x1xf32> to vector<8x10xf32>
    %37 = arith.subf %31, %36 : vector<8x10xf32>
    %38 = tpu.iota {dimensions = array<i32: 1>} : vector<8x10xi32>
    %cst_20 = arith.constant dense<0xFF800000> : vector<8xf32>
    %39 = vector.multi_reduction <maximumf>, %27, %cst_20 [1] : vector<8x10xf32> to vector<8xf32>
    %40 = vector.shape_cast %39 : vector<8xf32> to vector<8x1xf32>
    %41 = vector.broadcast %40 : vector<8x1xf32> to vector<8x10xf32>
    %42 = arith.cmpf oeq, %27, %41 : vector<8x10xf32>
    %c10_i32 = arith.constant 10 : i32
    %43 = vector.broadcast %c10_i32 : i32 to vector<8x10xi32>
    %44 = arith.select %42, %38, %43 : vector<8x10xi1>, vector<8x10xi32>
    %cst_21 = arith.constant dense<2147483647> : vector<8xi32>
    %45 = vector.multi_reduction <minsi>, %44, %cst_21 [1] : vector<8x10xi32> to vector<8xi32>
    %46 = vector.shape_cast %45 : vector<8xi32> to vector<8x1xi32>
    %47 = tpu.iota {dimensions = array<i32: 1>} : vector<8x10x16xi32>
    %48 = vector.shape_cast %46 : vector<8x1xi32> to vector<8x1x1xi32>
    %49 = vector.broadcast %48 : vector<8x1x1xi32> to vector<8x10x16xi32>
    %50 = arith.cmpi eq, %47, %49 : vector<8x10x16xi32>
    %51 = arith.extui %50 : vector<8x10x16xi1> to vector<8x10x16xi32>
    %52 = arith.sitofp %51 : vector<8x10x16xi32> to vector<8x10x16xf32>
    %53 = arith.mulf %0, %52 : vector<8x10x16xf32>
    %cst_22 = arith.constant dense<0.000000e+00> : vector<8x16xf32>
    %54 = vector.multi_reduction <add>, %53, %cst_22 [1] : vector<8x10x16xf32> to vector<8x16xf32>
    %55 = arith.truncf %54 : vector<8x16xf32> to vector<8x16xbf16>
    %c288 = arith.constant 288 : index
    %c0_23 = arith.constant 0 : index
    %56 = vector.load %arg3[%c288, %c0_23] : memref<560x128xbf16, #tpu.memory_space<vmem>>, vector<16x128xbf16>
    %cst_24 = arith.constant dense<0.000000e+00> : vector<8x128xf32>
    %57 = tpu.matmul %55, %56, %cst_24 {dimension_numbers = #tpu.dot_dimension_numbers<[1], [0], [0], [1], [0, 0, 1, 1], [], []>} : vector<8x16xbf16>, vector<16x128xbf16>, vector<8x128xf32> -> vector<8x128xf32>
    %58 = arith.addf %20, %57 : vector<8x128xf32>
    %cst_25 = arith.constant 0.000000e+00 : f32
    %59 = vector.broadcast %cst_25 : f32 to vector<8x128xf32>
    %60 = arith.maximumf %58, %59 : vector<8x128xf32>
    %61 = arith.truncf %60 : vector<8x128xf32> to vector<8x128xbf16>
    %c304 = arith.constant 304 : index
    %c0_26 = arith.constant 0 : index
    %62 = vector.load %arg3[%c304, %c0_26] : memref<560x128xbf16, #tpu.memory_space<vmem>>, vector<128x128xbf16>
    %cst_27 = arith.constant dense<0.000000e+00> : vector<8x128xf32>
    %63 = tpu.matmul %61, %62, %cst_27 {dimension_numbers = #tpu.dot_dimension_numbers<[1], [0], [0], [1], [0, 0, 1, 1], [], []>} : vector<8x128xbf16>, vector<128x128xbf16>, vector<8x128xf32> -> vector<8x128xf32>
    %c24 = arith.constant 24 : index
    %c0_28 = arith.constant 0 : index
    %64 = vector.load %arg4[%c24, %c0_28] : memref<40x128xf32, #tpu.memory_space<vmem>>, vector<8x128xf32>
    %65 = arith.addf %63, %64 : vector<8x128xf32>
    %cst_29 = arith.constant 0.000000e+00 : f32
    %66 = vector.broadcast %cst_29 : f32 to vector<8x128xf32>
    %67 = arith.maximumf %65, %66 : vector<8x128xf32>
    %68 = arith.truncf %67 : vector<8x128xf32> to vector<8x128xbf16>
    %c432 = arith.constant 432 : index
    %c0_30 = arith.constant 0 : index
    %69 = vector.load %arg3[%c432, %c0_30] : memref<560x128xbf16, #tpu.memory_space<vmem>>, vector<128x128xbf16>
    %cst_31 = arith.constant dense<0.000000e+00> : vector<8x128xf32>
    %70 = tpu.matmul %68, %69, %cst_31 {dimension_numbers = #tpu.dot_dimension_numbers<[1], [0], [0], [1], [0, 0, 1, 1], [], []>} : vector<8x128xbf16>, vector<128x128xbf16>, vector<8x128xf32> -> vector<8x128xf32>
    %c32_32 = arith.constant 32 : index
    %c0_33 = arith.constant 0 : index
    %71 = vector.load %arg4[%c32_32, %c0_33] : memref<40x128xf32, #tpu.memory_space<vmem>>, vector<8x128xf32>
    %72 = arith.addf %70, %71 : vector<8x128xf32>
    %cst_34 = arith.constant 0.000000e+00 : f32
    %73 = vector.broadcast %cst_34 : f32 to vector<8x128xf32>
    %74 = arith.maximumf %72, %73 : vector<8x128xf32>
    %75 = vector.extract_strided_slice %74 {offsets = [0, 0], sizes = [8, 8], strides = [1, 1]} : vector<8x128xf32> to vector<8x8xf32>
    %cst_35 = arith.constant dense<0xFF800000> : vector<8xf32>
    %76 = vector.multi_reduction <maximumf>, %75, %cst_35 [1] : vector<8x8xf32> to vector<8xf32>
    %77 = vector.shape_cast %76 : vector<8xf32> to vector<8x1xf32>
    %78 = vector.broadcast %77 : vector<8x1xf32> to vector<8x8xf32>
    %79 = arith.subf %75, %78 : vector<8x8xf32>
    %80 = math.exp %79 : vector<8x8xf32>
    %cst_36 = arith.constant dense<0.000000e+00> : vector<8xf32>
    %81 = vector.multi_reduction <add>, %80, %cst_36 [1] : vector<8x8xf32> to vector<8xf32>
    %82 = vector.shape_cast %81 : vector<8xf32> to vector<8x1xf32>
    %83 = math.log %82 : vector<8x1xf32>
    %84 = vector.broadcast %83 : vector<8x1xf32> to vector<8x8xf32>
    %85 = arith.subf %79, %84 : vector<8x8xf32>
    %cst_37 = arith.constant 0.000000e+00 : f32
    %86 = vector.broadcast %cst_37 : f32 to vector<8x6xf32>
    %cst_38 = arith.constant 0.000000e+00 : f32
    %87 = vector.broadcast %cst_38 : f32 to vector<8x88xf32>
    %88 = tpu.concatenate %37, %86, %54, %85, %87 in 1 : vector<8x10xf32>, vector<8x6xf32>, vector<8x16xf32>, vector<8x8xf32>, vector<8x88xf32> -> vector<8x128xf32>
    %c0_39 = arith.constant 0 : index
    %c0_40 = arith.constant 0 : index
    %89 = vector.load %arg5[%c0_39, %c0_40] : memref<8x128xf32, #tpu.memory_space<vmem>>, vector<8x128xf32>
    tpu.vector_store %arg5[%c0_39, %c0_40], %88 {strides = array<i32>} : memref<8x128xf32, #tpu.memory_space<vmem>>, vector<8x128xf32>,
    return
  }
  func.func @transform_0(%arg0: i32) -> (i32, i32, i32) {
    %c0_i32 = arith.constant 0 : i32
    %c0_i32_0 = arith.constant 0 : i32
    %c0_i32_1 = arith.constant 0 : i32
    return %arg0, %c0_i32, %c0_i32_0 : i32, i32, i32
  }
  func.func @transform_1(%arg0: i32) -> (i32, i32) {
    %c0_i32 = arith.constant 0 : i32
    %c0_i32_0 = arith.constant 0 : i32
    return %arg0, %c0_i32 : i32, i32
  }
  func.func @transform_2(%arg0: i32) -> (i32, i32) {
    %c0_i32 = arith.constant 0 : i32
    %c0_i32_0 = arith.constant 0 : i32
    %c0_i32_1 = arith.constant 0 : i32
    return %c0_i32, %c0_i32_0 : i32, i32
  }
  func.func @transform_3(%arg0: i32) -> (i32, i32) {
    %c0_i32 = arith.constant 0 : i32
    %c0_i32_0 = arith.constant 0 : i32
    %c0_i32_1 = arith.constant 0 : i32
    return %c0_i32, %c0_i32_0 : i32, i32
  }
  func.func @transform_4(%arg0: i32) -> (i32, i32) {
    %c0_i32 = arith.constant 0 : i32
    %c0_i32_0 = arith.constant 0 : i32
    return %arg0, %c0_i32 : i32, i32
  }
}

</mosaic_0001>

<bundles_post_ra>
// kernel: tpu_custom_call.1
= control target key start
LH: loop header
LB: loop body
LE: loop exit
PB: predicated region body
PF: predicated region fallthrough
CT: control target
= control target key end

     0   :  { %9 = vsyncpa [#allocation3], 0  ;;  %s2733_s0 = inlined_call_operand.vmem [shape: f32[16,10,16], index: 0, kind: input, shape index: {}]   ;;  %s2734_s1 = inlined_call_operand.vmem [shape: f32[16,32], index: 1, kind: input, shape index: {}]   ;;  %s2735_s2 = inlined_call_operand.vmem [shape: bf16[560,128], index: 2, kind: input, shape index: {}]   ;;  %s2736_s3 = inlined_call_operand.vmem [shape: f32[40,128], index: 3, kind: input, shape index: {}]   ;;  %s2737_s4 = inlined_call_operand.hbm [shape: f32[16,128], index: 4, kind: output, shape index: {}]  }
   0x1   :  { %11 = vsyncpa [#allocation3 + $0x1], 0  ;;  %s1897_s15 = smov 0   ;;  %s1899_s16 = smov 0  }
   0x2   :  { %s1901_s17 = smov 0   ;;  %s1903_s18 = smov 0  }
   0x3 LB: > { %s1918_s19 = sadd.s32 4294967295, %s1866_s18   ;;  %s1511_s20 = sadd.s32 4294967294, %s1866_s18   ;;  %s1866_s18 = sphi %s1903_s18, %s2859_s18   ;;  %s1862_s17 = sphi %s1901_s17, %s2858_s17   ;;  %s1858_s16 = sphi %s1899_s16, %s2857_s16   ;;  %s1854_s15 = sphi %s1897_s15, %s2856_s15  }
   0x4   : > { %s1922_s21 = sadd.s32 1, %s1866_s18   ;;  %s118_s22 = sadd.s32 1, %s1862_s17 }
   0x5   : > { %s115_s23 = ssub.s32 %s1866_s18, %s1922_s21  ;;  %p128_p0 = scmp.ne.s32.totalorder %s1862_s17, %s1858_s16 }
   0x6   : > { %p116_p1 = scmp.eq.s32.totalorder %s115_s23, 0  ;;  %p129_p2 = scmp.eq.s32.totalorder %s1918_s19, 1 }
   0x7   : > { %p134_p3 = scmp.ne.s32.totalorder %s1858_s16, %s1854_s15  ;;  %p135_p4 = scmp.eq.s32.totalorder %s1511_s20, 1 }
   0x8   : > { %s1933_s24 = scalar_select %p116_p1, %s1862_s17, %s118_s22  }
   0x9   : > { %p1935_p5 = por %p129_p2, %p128_p0  ;;  %p1939_p6 = por %p135_p4, %p134_p3 }
   0xa   : > { %p1514_p7 = scmp.ge.s32.totalorder %s1866_s18, 1  ;;  %p176_p8 = scmp.lt.s32.totalorder %s1866_s18, 3 }
   0xc   : > { %p177_p9 = pnand %p1514_p7, %p176_p8 }
   0xe   : > { %180 = sbr.rel (%p177_p9) target bundleno = 1930 (0x78a), region = 36 }
  0x13   : > { %v1684_v0 = vld [vmem:[%s2735_s2 + $0x8] sm:$0xff]  ;;  %p214_p10 = scmp.lt.s32.totalorder %s1918_s19, 1  ;;  %v1683_v2 = vld [vmem:[%s2735_s2] sm:$0xff]  ;;  %vm2738_vm0 = vcmask 261120   ;;  %v1690_v5 = vld [vmem:[%s2735_s2 + $0x38] sm:$0xff]  ;;  %s2012_s12 = sshll.u32 %s1918_s19, 3 }
  0x14   : > { %v1692_v1 = vld [vmem:[%s2735_s2 + $0x48] sm:$0xff]  ;;  %264 = vmatpush.bf16.msra.mxu0 %v1684_v0  ;;  %v1691_v3 = vld [vmem:[%s2735_s2 + $0x40] sm:$0xff]  ;;  %v1689_v7 = vld [vmem:[%s2735_s2 + $0x30] sm:$0xff]  ;;  %p208_p11 = scmp.lt.s32.totalorder %s2012_s12, 15  ;;  %vm2751_vm1 = vcmask 130048   ;;  %vm2739_vm2 = vcmask 123904  }
  0x15   : > { %s215_s7 = scalar_select %p214_p10, %s1918_s19, 1  ;;  %338 = vmatpush.bf16.msra.mxu1 %v1692_v1  ;;  %v1688_v8 = vld [vmem:[%s2735_s2 + $0x28] sm:$0xff]  ;;  %v1687_v9 = vld [vmem:[%s2735_s2 + $0x20] sm:$0xff]  ;;  %v1686_v10 = vld [vmem:[%s2735_s2 + $0x18] sm:$0xff]  ;;  %vm2750_vm3 = vcmask 130112   ;;  %vm2748_vm4 = vcmask 1041409  }
  0x16   : > { %v1685_v11 = vld [vmem:[%s2735_s2 + $0x10] sm:$0xff]  ;;  %v1700_v12 = vld [vmem:[%s2735_s2 + $0x88] sm:$0xff]  ;;  %v1699_v13 = vld [vmem:[%s2735_s2 + $0x80] sm:$0xff]  ;;  %vm2747_vm5 = vcmask 1042434   ;;  %vm2749_vm6 = vcmask 1043459   ;;  %vm2746_vm7 = vcmask 1044484  }
  0x17   : > { %s1519_s10 = sshll.u32 %s215_s7, 3  ;;  %418 = vmatpush.bf16.msra.mxu2 %v1700_v12  ;;  %v1698_v14 = vld [vmem:[%s2735_s2 + $0x78] sm:$0xff]  ;;  %v1697_v15 = vld [vmem:[%s2735_s2 + $0x70] sm:$0xff]  ;;  %v1696_v16 = vld [vmem:[%s2735_s2 + $0x68] sm:$0xff]  ;;  %vm2745_vm8 = vcmask 1045509   ;;  %vm2744_vm9 = vcmask 1046534  }
  0x18   : > { %s217_s13 = scalar_lea.vmem %s2734_s1, %s1519_s10  ;;  %265 = vmatpush.bf16.msra.mxu0 %v1683_v2  ;;  %v1695_v17 = vld [vmem:[%s2735_s2 + $0x60] sm:$0xff]  ;;  %v1694_v24 = vld [vmem:[%s2735_s2 + $0x58] sm:$0xff]  ;;  %v1693_v25 = vld [vmem:[%s2735_s2 + $0x50] sm:$0xff]  ;;  %vm2743_vm10 = vcmask 1047559   ;;  %vm2742_vm11 = vcmask 80896   ;;  %s1870_s6 = smov 16  }
  0x19   : > { %v235_v4 = vld [vmem:[%s217_s13] sm:$0xff]  ;;  %339 = vmatpush.bf16.msra.mxu1 %v1691_v3  ;;  %v289_v26 = vld [vmem:[%s2736_s3 + $0x8] sm:$0xff]  ;;  %s209_s13 = scalar_select %p208_p11, %s2012_s12, 15  ;;  %v369_v32 = vld [vmem:[%s2736_s3 + $0x10] sm:$0xff] }
  0x1a   : > { %v236_v6 = vpack.c.bf16 %v235_v4, %v235_v4  ;;  %v241_v18 = vld [vmem:[%s2736_s3] sm:$0xff]  ;;  %s1871_s7 = smov 32   ;;  %s204_s8 = sand.u32 1, %s1858_s16  }
  0x1b   : > { %419 = vmatpush.bf16.msra.mxu2 %v1699_v13  ;;  %s1682_s22 = sshll.u32 %s209_s13, 4  ;;  %s1515_s9 = sshll.u32 %s204_s8, 3 }
  0x1c   : > { %1528 = vmatmul.msk.bf16.vlgmr.msra.gmra.mxu0 %vm2738_vm0, %v236_v6  ;;  %s2024_s28 = scalar_lea.vmem %s2733_s0, %s1682_s22  ;;  %s1435_s13 = scalar_lea.hbm %s2737_s4, %s2012_s12 }
  0x1d   : > { %340 = vmatpush.bf16.msra.mxu1 %v1690_v5  ;;  %v2030_v36 = vld [vmem:[%s2024_s28] sm:$0xff]  ;;  %v2039_v41 = vld [vmem:[%s2024_s28 + $0x10] sm:$0xff]  ;;  %v2046_v49 = vld [vmem:[%s2024_s28 + $0x8] sm:$0x3]  ;;  %s206_s14 = scalar_lea.vmem [#allocation2], %s1515_s9  ;;  %s1439_s22 = sshll.u32 %s1435_s13, 4  ;;  %s1440_s22 = int_to_ptr.hbm [resolvable:$true] %s1439_s22 }
  0x1e   : > { %v2036_v40 = vld [vmem:[%s2024_s28 + $0x20] sm:$0xff]  ;;  %v2051_v52 = vld [vmem:[%s2024_s28 + $0x28] sm:$0x3]  ;;  %v2054_v53 = vld [vmem:[%s2024_s28 + $0x18] sm:$0x3]  ;;  %s1437_s20 = sshll.u32 %s206_s14, 4  ;;  %s1438_s20 = int_to_ptr.vmem [resolvable:$true] %s1437_s20 }
  0x1f   : > { %420 = vmatpush.bf16.msra.mxu2 %v1698_v14  ;;  %v2063_v61 = vld [vmem:[%s2024_s28 + $0x30] sm:$0xff]  ;;  %v2068_v1 = vld [vmem:[%s2024_s28 + $0x40] sm:$0xff]  ;;  %v2071_v2 = vld [vmem:[%s2024_s28 + $0x38] sm:$0x3]  ;;  %s1425_s23 = scalar_lea.sflag [#allocation3], %s204_s8  ;;  %s1818_s27 = sshra.s32 %s1440_s22, 4  ;;  %s1819_s27 = int_to_ptr.hbm [resolvable:$true] %s1818_s27 }
  0x20   : > { %v2084_v12 = vld [vmem:[%s2024_s28 + $0x58] sm:$0x3]  ;;  %v2087_v13 = vld [vmem:[%s2024_s28 + $0x50] sm:$0xff]  ;;  %s1820_s12 = scalar_lea.hbm %s1819_s27, 8  ;;  %s1824_s29 = scalar_lea.hbm %s2737_s4, 16 }
  0x21   : > { %341 = vmatpush.bf16.msra.mxu1 %v1689_v7  ;;  %p1821_p12 = scmp.ne.s32.totalorder %s1819_s27, %s1820_s12  ;;  %p1825_p1 = scmp.lt.s32.totalorder %s1819_s27, %s2737_s4 }
  0x22   : > { %p1826_p2 = scmp.lt.s32.totalorder %s1824_s29, %s1820_s12 }
  0x23   : > { %421 = vmatpush.bf16.msra.mxu2 %v1697_v15  ;;  %p1822_p13 = pnand %p1821_p12, %p1935_p5 }
  0x24   : > { %p1827_p3 = por %p1826_p2, %p1825_p1 }
  0x25   : > { %342 = vmatpush.bf16.msra.mxu1 %v1688_v8  ;;  %v2079_v8 = vld [vmem:[%s2024_s28 + $0x48] sm:$0x3]  ;;  %p1823_p0 = pneg %p1822_p13 }
  0x27   : > { %422 = vmatpush.bf16.msra.mxu2 %v1696_v16  ;;  %p1828_p4 = pnand %p1827_p3, %p1823_p0 }
  0x29   : > { %343 = vmatpush.bf16.msra.mxu1 %v1687_v9 }
  0x2b   : > { %423 = vmatpush.bf16.msra.mxu2 %v1695_v17 }
  0x2d   : > { %344 = vmatpush.bf16.msra.mxu1 %v1686_v10 }
  0x2f   : > { %424 = vmatpush.bf16.msra.mxu2 %v1694_v24 }
  0x31   : > { %345 = vmatpush.bf16.msra.mxu1 %v1685_v11 }
  0x33   : > { %425 = vmatpush.bf16.msra.mxu2 %v1693_v25  ;;  %v2101_v25 = vld [vmem:[%s2024_s28 + $0x70] sm:$0xff] }
  0x99   : > { %v267_v19 = vpop.f32.mrf.mxu0 }
  0x9a   : > { %v268_v20 = vadd.f32 %v267_v19, %v241_v18 }
  0x9c   : > { %v271_v21 = vmax.f32 %v268_v20, 0.0 }
  0x9e   : > { %v272_v22 = vpack.c.bf16 %v271_v21, %v271_v21  ;;  %v2096_v21 = vld [vmem:[%s2024_s28 + $0x60] sm:$0xff] }
  0xa0   : > { %346 = vmatmul.bf16.vlgmr.msra.gmra.mxu1 %v272_v22 }
  0xa1   : > { %v269_v23 = vpop.f32.mrf.mxu0 }
 0x11d   : > { %v347_v27 = vpop.f32.mrf.mxu1 }
 0x11e   : > { %v348_v28 = vadd.f32 %v347_v27, %v289_v26  ;;  %v2104_v26 = vld [vmem:[%s2024_s28 + $0x68] sm:$0x3] }
 0x120   : > { %v351_v29 = vmax.f32 %v348_v28, 0.0 }
 0x122   : > { %v352_v30 = vpack.c.bf16 %v351_v29, %v351_v29 }
 0x124   : > { %426 = vmatmul.bf16.vlgmr.msra.gmra.mxu2 %v352_v30 }
 0x125   : > { %v349_v31 = vpop.f32.mrf.mxu1 }
 0x126   : > { %v2111_v31 = vld [vmem:[%s2024_s28 + $0x78] sm:$0x3] }
 0x1a7   : > { %v427_v33 = vpop.f32.mrf.mxu2 }
 0x1a8   : > { %v2019_v34 = vadd.f32 %v427_v33, %v369_v32 }
 0x1aa   : > { %v2027_v35 = vmax.f32 %v2019_v34, 0.0 }
 0x1ac   : > { %v440_v37 = vperm.slane %v2027_v35, 0  ;;  %v434_v38 = vrot.slane %v2027_v35, 2  ;;  %v433_v39 = vrot.slane %v2027_v35, 1  ;;  %v435_v55 = vrot.slane %v2027_v35, 3 }
 0x1ad   : > { %v436_v58 = vrot.slane %v2027_v35, 4  ;;  %v437_v6 = vrot.slane %v2027_v35, 5  ;;  %v438_v15 = vrot.slane %v2027_v35, 6  ;;  %v439_v18 = vrot.slane %v2027_v35, 7 }
 0x1ae   : > { %v456_v42 = vmul.f32 %v440_v37, %v2030_v36  ;;  %v442_v43 = vperm.slane %v434_v38, 0  ;;  %v441_v44 = vperm.slane %v433_v39, 0  ;;  %v457_v54 = vmul.f32 %v440_v37, %v2046_v49 }
 0x1af   : > { %v429_v45 = vpop.f32.mrf.mxu2  ;;  %v443_v60 = vperm.slane %v435_v55, 0  ;;  %v444_v0 = vperm.slane %v436_v58, 0  ;;  %v445_v11 = vperm.slane %v437_v6, 0  ;;  %v446_v20 = vperm.slane %v438_v15, 0 }
 0x1b0   : > { %v473_v46 = vsel %vm2751_vm1, %v456_v42, 0.0  ;;  %v460_v47 = vmul.f32 %v442_v43, %v2036_v40  ;;  %v458_v48 = vmul.f32 %v441_v44, %v2039_v41  ;;  %v461_v56 = vmul.f32 %v442_v43, %v2051_v52 }
 0x1b1   : > { %474 = vadd.xlane.f32.xlu0 %v473_v46  ;;  %v459_v57 = vmul.f32 %v441_v44, %v2054_v53  ;;  %v477_v59 = vsel %vm2739_vm2, %v457_v54, 0.0  ;;  %v462_v3 = vmul.f32 %v443_v60, %v2063_v61  ;;  %v464_v4 = vmul.f32 %v444_v0, %v2068_v1 }
 0x1b2   : > { %v486_v50 = vsel %vm2751_vm1, %v460_v47, 0.0  ;;  %v480_v51 = vsel %vm2751_vm1, %v458_v48, 0.0  ;;  %v489_v62 = vsel %vm2739_vm2, %v461_v56, 0.0  ;;  %v463_v5 = vmul.f32 %v443_v60, %v2071_v2 }
 0x1b3   : > { %487 = vadd.xlane.f32.xlu2 %v486_v50  ;;  %481 = vadd.xlane.f32.xlu1 %v480_v51  ;;  %v483_v63 = vsel %vm2739_vm2, %v459_v57, 0.0  ;;  %v492_v7 = vsel %vm2751_vm1, %v462_v3, 0.0  ;;  %v498_v9 = vsel %vm2751_vm1, %v464_v4, 0.0  ;;  %v465_v14 = vmul.f32 %v444_v0, %v2079_v8 }
 0x1b4   : > { %v495_v10 = vsel %vm2739_vm2, %v463_v5, 0.0  ;;  %v467_v16 = vmul.f32 %v445_v11, %v2084_v12  ;;  %v466_v17 = vmul.f32 %v445_v11, %v2087_v13  ;;  %v447_v24 = vperm.slane %v439_v18, 0 }
 0x1b5   : > { %v501_v19 = vsel %vm2739_vm2, %v465_v14, 0.0  ;;  %v468_v27 = vmul.f32 %v446_v20, %v2096_v21  ;;  %v469_v29 = vmul.f32 %v446_v20, %v2104_v26  ;;  %v538_v43 = vlaneseq }
 0x1b6   : > { %v507_v22 = vsel %vm2739_vm2, %v467_v16, 0.0  ;;  %v504_v23 = vsel %vm2751_vm1, %v466_v17, 0.0  ;;  %v470_v28 = vmul.f32 %v447_v24, %v2101_v25  ;;  %v471_v35 = vmul.f32 %v447_v24, %v2111_v31 }
 0x1b7   : > { %v510_v30 = vsel %vm2751_vm1, %v468_v27, 0.0  ;;  %v513_v33 = vsel %vm2739_vm2, %v469_v29, 0.0  ;;  %v2125_v45 = vshrl.u32 %v538_v43, 7  ;;  %v2138_v51 = vand.u32 127, %v538_v43 }
 0x1b8   : > { %v516_v32 = vsel %vm2751_vm1, %v470_v28, 0.0  ;;  %v519_v37 = vsel %vm2739_vm2, %v471_v35, 0.0 }
 0x1b9   : > { %478 = vadd.xlane.f32.xlu0 %v477_v59  ;;  %v2132_v48 = vadd.s32 8, %v2125_v45  ;;  %1761 = vset.pattern.permute.xlu2 %v2125_v45  ;;  %v2149_v57 = vadd.s32 4294967288, %v2138_v51 }
 0x1bb   : > { %490 = vadd.xlane.f32.xlu2 %v489_v62  ;;  %484 = vadd.xlane.f32.xlu1 %v483_v63 }
 0x1bc   : > { %1762 = vset.pattern.permute.xlu0 %v2132_v48 }
 0x1c1   : > { %493 = vadd.xlane.f32.xlu0 %v492_v7 }
 0x1c3   : > { %499 = vadd.xlane.f32.xlu2 %v498_v9  ;;  %496 = vadd.xlane.f32.xlu1 %v495_v10 }
 0x1c9   : > { %502 = vadd.xlane.f32.xlu0 %v501_v19 }
 0x1cb   : > { %508 = vadd.xlane.f32.xlu2 %v507_v22  ;;  %505 = vadd.xlane.f32.xlu1 %v504_v23 }
 0x1d1   : > { %511 = vadd.xlane.f32.xlu0 %v510_v30 }
 0x1d3   : > { %517 = vadd.xlane.f32.xlu2 %v516_v32  ;;  %514 = vadd.xlane.f32.xlu1 %v513_v33 }
 0x1d9   : > { %520 = vadd.xlane.f32.xlu0 %v519_v37 }
 0x1eb   : > { %804 = vperm.xlu2 %1761, %v2138_v51  }
 0x1ed   : > { %810 = vperm.xlu0 %1762, %v2138_v51  }
 0x224   : > { %v2117_v38 = vpop.xlane.xlu0 %474 }
 0x225   : > { %v540_v3 = vperm.slane %v2117_v38, %v2138_v51 }
 0x226   : > { %v2119_v39 = vpop.xlane.xlu2 %487  ;;  %v2121_v42 = vpop.xlane.xlu1 %481 }
 0x227   : > { %v545_v62 = vperm.slane %v2121_v42, %v2138_v51  ;;  %v548_v6 = vperm.slane %v2119_v39, %v2138_v51 }
 0x22c   : > { %v2123_v44 = vpop.xlane.xlu0 %478 }
 0x22d   : > { %v542_v63 = vperm.slane %v2123_v44, %v2149_v57 }
 0x22e   : > { %v2127_v46 = vpop.xlane.xlu2 %490  ;;  %v2129_v47 = vpop.xlane.xlu1 %484 }
 0x22f   : > { %v546_v59 = vperm.slane %v2129_v47, %v2149_v57  ;;  %v549_v0 = vperm.slane %v2127_v46, %v2149_v57  ;;  %v544_v10 = vsel %vm2750_vm3, %v542_v63, %v540_v3 }
 0x231   : > { %v547_v4 = vsel %vm2750_vm3, %v546_v59, %v545_v62  ;;  %v550_v14 = vsel %vm2750_vm3, %v549_v0, %v548_v6 }
 0x232   : > { %v567_v15 = vsel %vm2748_vm4, %v547_v4, %v544_v10  ;;  %v1868_v4 = vmov 0  }
 0x233   : > { %v569_v24 = vsel %vm2747_vm5, %v550_v14, %v567_v15  ;;  %1763 = vset.pattern.permute.xlu1 %v1868_v4  ;;  %1764 = vset.pattern.permute.xlu2 %v1868_v4 }
 0x234   : > { %v2136_v50 = vpop.xlane.xlu0 %493  ;;  %1765 = vset.pattern.permute.xlu0 %v1868_v4 }
 0x235   : > { %v551_v11 = vperm.slane %v2136_v50, %v2138_v51 }
 0x236   : > { %v2140_v54 = vpop.xlane.xlu2 %499  ;;  %v2142_v55 = vpop.xlane.xlu1 %496 }
 0x237   : > { %v552_v5 = vperm.slane %v2142_v55, %v2149_v57  ;;  %v554_v16 = vperm.slane %v2140_v54, %v2138_v51 }
 0x239   : > { %v553_v18 = vsel %vm2750_vm3, %v552_v5, %v551_v11 }
 0x23a   : > { %v571_v27 = vsel %vm2749_vm6, %v553_v18, %v569_v24 }
 0x23c   : > { %v2146_v56 = vpop.xlane.xlu0 %502 }
 0x23d   : > { %v555_v7 = vperm.slane %v2146_v56, %v2149_v57 }
 0x23e   : > { %v2151_v58 = vpop.xlane.xlu1 %505  ;;  %v2155_v60 = vpop.xlane.xlu2 %508 }
 0x23f   : > { %v558_v19 = vperm.slane %v2155_v60, %v2149_v57  ;;  %v557_v20 = vperm.slane %v2151_v58, %v2138_v51  ;;  %v556_v22 = vsel %vm2750_vm3, %v555_v7, %v554_v16 }
 0x240   : > { %v573_v32 = vsel %vm2746_vm7, %v556_v22, %v571_v27 }
 0x241   : > { %v559_v30 = vsel %vm2750_vm3, %v558_v19, %v557_v20 }
 0x242   : > { %v575_v59 = vsel %vm2745_vm8, %v559_v30, %v573_v32 }
 0x244   : > { %v2172_v9 = vpop.xlane.xlu0 %511 }
 0x245   : > { %v560_v28 = vperm.slane %v2172_v9, %v2138_v51 }
 0x246   : > { %v2181_v17 = vpop.xlane.xlu1 %514  ;;  %v2195_v29 = vpop.xlane.xlu2 %517 }
 0x247   : > { %v561_v23 = vperm.slane %v2181_v17, %v2149_v57  ;;  %v563_v37 = vperm.slane %v2195_v29, %v2138_v51 }
 0x249   : > { %v562_v35 = vsel %vm2750_vm3, %v561_v23, %v560_v28 }
 0x24a   : > { %v577_v63 = vsel %vm2744_vm9, %v562_v35, %v575_v59 }
 0x24c   : > { %v2199_v33 = vpop.xlane.xlu0 %520 }
 0x24d   : > { %v564_v43 = vperm.slane %v2199_v33, %v2149_v57 }
 0x24e   : > { %v805_v6 = vpop.permute.xlu2 %804 }
 0x24f   : > { %v565_v62 = vsel %vm2750_vm3, %v564_v43, %v563_v37 }
 0x250   : > { %v579_v0 = vsel %vm2743_vm10, %v565_v62, %v577_v63 }
 0x251   : > { %v582_v3 = vsel %vm2742_vm11, %v579_v0, -inf }
 0x252   : > { %583 = vmax.xlane.f32.xlu1 %v582_v3 }
 0x25f   : > { %v811_v7 = vpop.permute.xlu0 %810 }
 0x2c5   : > { %v584_v5 = vpop.xlane.xlu1 %583 }
 0x2c6   : > { %v2211_v10 = vperm.slane %v584_v5, 3  ;;  %v586_v11 = vperm.slane %v584_v5, 0  ;;  %v2217_v18 = vperm.slane %v584_v5, 5  ;;  %v587_v19 = vperm.slane %v584_v5, 1 }
 0x2c7   : > { %v2223_v24 = vperm.slane %v584_v5, 7  ;;  %v2225_v27 = vperm.slane %v584_v5, 2  ;;  %v590_v35 = vperm.slane %v584_v5, 4  ;;  %v2239_v63 = vperm.slane %v584_v5, 6 }
 0x2c8   : > { %vm790_vm12 = vcmp.eq.f32.partialorder %v2136_v50, %v2211_v10  ;;  %vm784_vm13 = vcmp.eq.f32.partialorder %v2117_v38, %v586_v11  ;;  %vm785_vm14 = vcmp.eq.f32.partialorder %v2123_v44, %v586_v11  ;;  %vm795_vm15 = vcmp.eq.f32.partialorder %v2155_v60, %v2217_v18 }
 0x2c9   : > { %v818_v14 = vsel %vm790_vm12, %v805_v6, 10  ;;  %v812_v15 = vsel %vm784_vm13, %v805_v6, 10  ;;  %v813_v16 = vsel %vm785_vm14, %v811_v7, 10  ;;  %vm787_vm0 = vcmp.eq.f32.partialorder %v2129_v47, %v587_v19 }
 0x2ca   : > { %847 = vperm.xlu0 %1765, %v818_v14   ;;  %829 = vperm.xlu1 %1763, %v812_v15   ;;  %vm786_vm2 = vcmp.eq.f32.partialorder %v2121_v42, %v587_v19  ;;  %v823_v20 = vsel %vm795_vm15, %v811_v7, 10  ;;  %v815_v22 = vsel %vm787_vm0, %v811_v7, 10  ;;  %vm798_vm12 = vcmp.eq.f32.partialorder %v2195_v29, %v2223_v24 }
 0x2cb   : > { %832 = vperm.xlu2 %1764, %v813_v16   ;;  %v814_v23 = vsel %vm786_vm2, %v805_v6, 10  ;;  %vm789_vm13 = vcmp.eq.f32.partialorder %v2127_v46, %v2225_v27  ;;  %vm788_vm14 = vcmp.eq.f32.partialorder %v2119_v39, %v2225_v27  ;;  %v826_v28 = vsel %vm798_vm12, %v805_v6, 10 }
 0x2cc   : > { %v817_v30 = vsel %vm789_vm13, %v811_v7, 10  ;;  %v816_v32 = vsel %vm788_vm14, %v805_v6, 10  ;;  %vm792_vm0 = vcmp.eq.f32.partialorder %v2140_v54, %v590_v35  ;;  %vm791_vm2 = vcmp.eq.f32.partialorder %v2142_v55, %v2211_v10 }
 0x2cd   : > { %v820_v37 = vsel %vm792_vm0, %v805_v6, 10  ;;  %v819_v43 = vsel %vm791_vm2, %v811_v7, 10  ;;  %vm794_vm15 = vcmp.eq.f32.partialorder %v2151_v58, %v2217_v18  ;;  %vm793_vm12 = vcmp.eq.f32.partialorder %v2146_v56, %v590_v35 }
 0x2ce   : > { %v822_v59 = vsel %vm794_vm15, %v805_v6, 10  ;;  %v821_v62 = vsel %vm793_vm12, %v811_v7, 10  ;;  %vm797_vm13 = vcmp.eq.f32.partialorder %v2181_v17, %v2239_v63  ;;  %vm796_vm14 = vcmp.eq.f32.partialorder %v2172_v9, %v2239_v63 }
 0x2cf   : > { %v825_v0 = vsel %vm797_vm13, %v811_v7, 10  ;;  %v824_v3 = vsel %vm796_vm14, %v805_v6, 10  ;;  %v2246_v4 = vsub.f32 %v2117_v38, %v586_v11  ;;  %vm799_vm0 = vcmp.eq.f32.partialorder %v2199_v33, %v2223_v24 }
 0x2d0   : > { %v827_v14 = vsel %vm799_vm0, %v811_v7, 10  ;;  %v2252_v15 = vsub.f32 %v2123_v44, %v586_v11  ;;  %v2256_v6 = vsub.f32 %v2121_v42, %v587_v19  ;;  %v2260_v7 = vsub.f32 %v2129_v47, %v587_v19 }
 0x2d1   : > { %2756 = vst [vmem:[#allocation5_spill] sm:$0xff] %v2246_v4  ;;  %v618_v5 = vmul.f32 1.442695, %v2246_v4  ;;  %v2265_v11 = vsub.f32 %v2119_v39, %v2225_v27 }
 0x2d2   : > { %862 = vperm.xlu0 %1765, %v823_v20   ;;  %838 = vperm.xlu1 %1763, %v815_v22   ;;  %v620_v16 = vmul.f32 1.442695, %v2252_v15  ;;  %v622_v38 = vmul.f32 1.442695, %v2256_v6 }
 0x2d3   : > { %835 = vperm.xlu2 %1764, %v814_v23   ;;  %1766 = vpow2.f32 %v618_v5  ;;  %v624_v23 = vmul.f32 1.442695, %v2260_v7  ;;  %2757 = vst [vmem:[#allocation6_spill] sm:$0xff] %v2265_v11  ;;  %v626_v42 = vmul.f32 1.442695, %v2265_v11 }
 0x2d4   : > { %1768 = vpow2.f32 %v620_v16 }
 0x2d5   : > { %1770 = vpow2.f32 %v622_v38 }
 0x2d6   : > { %1772 = vpow2.f32 %v624_v23 }
 0x2d7   : > { %1774 = vpow2.f32 %v626_v42 }
 0x2d9   : > { %v1767_v20 = vpop.eup %1766 }
 0x2da   : > { %871 = vperm.xlu0 %1765, %v826_v28   ;;  %844 = vperm.xlu1 %1763, %v817_v30   ;;  %v1769_v22 = vpop.eup %1768  ;;  %v2270_v30 = vsub.f32 %v2136_v50, %v2211_v10 }
 0x2db   : > { %841 = vperm.xlu2 %1764, %v816_v32   ;;  %v1771_v44 = vpop.eup %1770  ;;  %v2274_v32 = vsub.f32 %v2140_v54, %v590_v35 }
 0x2dc   : > { %v1773_v28 = vpop.eup %1772  ;;  %v630_v47 = vmul.f32 1.442695, %v2270_v30 }
 0x2dd   : > { %v1775_v19 = vpop.eup %1774  ;;  %v634_v39 = vmul.f32 1.442695, %v2274_v32 }
 0x2de   : > { %1776 = vpow2.f32 %v630_v47 }
 0x2df   : > { %1778 = vpow2.f32 %v634_v39 }
 0x2e2   : > { %853 = vperm.xlu1 %1763, %v820_v37  }
 0x2e3   : > { %850 = vperm.xlu2 %1764, %v819_v43  }
 0x2e4   : > { %v1777_v43 = vpop.eup %1776 }
 0x2ea   : > { %859 = vperm.xlu1 %1763, %v822_v59   ;;  %v2278_v59 = vsub.f32 %v2146_v56, %v590_v35  ;;  %v2288_v56 = vsub.f32 %v2199_v33, %v2223_v24 }
 0x2eb   : > { %856 = vperm.xlu2 %1764, %v821_v62  }
 0x2ec   : > { %v636_v50 = vmul.f32 1.442695, %v2278_v59  ;;  %v648_v35 = vmul.f32 1.442695, %v2288_v56 }
 0x2ee   : > { %1780 = vpow2.f32 %v636_v50 }
 0x2f2   : > { %868 = vperm.xlu1 %1763, %v825_v0   ;;  %v1779_v0 = vpop.eup %1778 }
 0x2f3   : > { %865 = vperm.xlu2 %1764, %v824_v3   ;;  %v2283_v3 = vsub.f32 %v2172_v9, %v2239_v63 }
 0x2f5   : > { %v642_v54 = vmul.f32 1.442695, %v2283_v3 }
 0x2f7   : > { %1782 = vpow2.f32 %v642_v54 }
 0x2f8   : > { %1784 = vpow2.f32 %v648_v35 }
 0x2fb   : > { %874 = vperm.xlu2 %1764, %v827_v14   ;;  %v1781_v14 = vpop.eup %1780 }
 0x303   : > { %667 = vperm.xlu2 %1764, %v1767_v20   ;;  %v1783_v20 = vpop.eup %1782 }
 0x304   : > { %v1785_v9 = vpop.eup %1784 }
 0x30b   : > { %670 = vperm.xlu2 %1764, %v1769_v22  }
 0x313   : > { %673 = vperm.xlu2 %1764, %v1771_v44  }
 0x31b   : > { %676 = vperm.xlu2 %1764, %v1773_v28  }
 0x323   : > { %679 = vperm.xlu2 %1764, %v1775_v19  }
 0x325   : > { %v833_v37 = vpop.permute.xlu2 %832 }
 0x32b   : > { %685 = vperm.xlu2 %1764, %v1777_v43  }
 0x32d   : > { %v836_v62 = vpop.permute.xlu2 %835 }
 0x32e   : > { %v879_v43 = vperm.slane %v836_v62, %v2138_v51 }
 0x333   : > { %691 = vperm.xlu2 %1764, %v1779_v0  }
 0x335   : > { %v842_v5 = vpop.permute.xlu2 %841 }
 0x336   : > { %v882_v54 = vperm.slane %v842_v5, %v2138_v51 }
 0x33b   : > { %694 = vperm.xlu2 %1764, %v1781_v14   ;;  %v877_v14 = vperm.slane %v833_v37, %v2149_v57 }
 0x33c   : > { %v830_v16 = vpop.permute.xlu1 %829  ;;  %v848_v42 = vpop.permute.xlu0 %847 }
 0x33d   : > { %v851_v38 = vpop.permute.xlu2 %850  ;;  %v876_v50 = vperm.slane %v830_v16, %v2138_v51 }
 0x33f   : > { %v878_v11 = vsel %vm2750_vm3, %v877_v14, %v876_v50 }
 0x343   : > { %703 = vperm.xlu2 %1764, %v1783_v20  }
 0x344   : > { %v839_v22 = vpop.permute.xlu1 %838  ;;  %v863_v19 = vpop.permute.xlu0 %862 }
 0x345   : > { %v857_v44 = vpop.permute.xlu2 %856  ;;  %v880_v39 = vperm.slane %v839_v22, %v2149_v57  ;;  %v886_v22 = vperm.slane %v851_v38, %v2149_v57  ;;  %v892_v37 = vperm.slane %v863_v19, %v2149_v57 }
 0x346   : > { %v889_v5 = vperm.slane %v857_v44, %v2149_v57 }
 0x347   : > { %v881_v35 = vsel %vm2750_vm3, %v880_v39, %v879_v43 }
 0x348   : > { %v900_v16 = vsel %vm2748_vm4, %v881_v35, %v878_v11 }
 0x34b   : > { %712 = vperm.xlu2 %1764, %v1785_v9  }
 0x34c   : > { %v845_v23 = vpop.permute.xlu1 %844 }
 0x34d   : > { %v866_v47 = vpop.permute.xlu2 %865  ;;  %v883_v33 = vperm.slane %v845_v23, %v2149_v57  ;;  %v885_v23 = vperm.slane %v848_v42, %v2138_v51 }
 0x34f   : > { %v884_v20 = vsel %vm2750_vm3, %v883_v33, %v882_v54  ;;  %v872_v33 = vpop.permute.xlu0 %871  ;;  %v887_v43 = vsel %vm2750_vm3, %v886_v22, %v885_v23 }
 0x350   : > { %v901_v39 = vsel %vm2747_vm5, %v884_v20, %v900_v16  ;;  %v897_v19 = vperm.slane %v872_v33, %v2138_v51  ;;  %v2335_v33 = vsub.f32 %v2181_v17, %v2239_v63  ;;  %v2345_v63 = vsub.f32 %v2155_v60, %v2217_v18 }
 0x351   : > { %v902_v11 = vsel %vm2749_vm6, %v887_v43, %v901_v39 }
 0x352   : > { %2758 = vst [vmem:[#allocation7_spill] sm:$0xff] %v2345_v63 }
 0x354   : > { %v854_v28 = vpop.permute.xlu1 %853 }
 0x355   : > { %v888_v9 = vperm.slane %v854_v28, %v2138_v51  ;;  %v875_v4 = vpop.permute.xlu2 %874 }
 0x356   : > { %v898_v38 = vperm.slane %v875_v4, %v2149_v57 }
 0x357   : > { %v890_v28 = vsel %vm2750_vm3, %v889_v5, %v888_v9  ;;  %v2330_v5 = vsub.f32 %v2151_v58, %v2217_v18 }
 0x358   : > { %v903_v54 = vsel %vm2746_vm7, %v890_v28, %v902_v11  ;;  %v899_v20 = vsel %vm2750_vm3, %v898_v38, %v897_v19  ;;  %v644_v28 = vmul.f32 1.442695, %v2335_v33 }
 0x35c   : > { %v860_v0 = vpop.permute.xlu1 %859 }
 0x35d   : > { %v891_v62 = vperm.slane %v860_v0, %v2138_v51  ;;  %v894_v0 = vperm.slane %v866_v47, %v2138_v51 }
 0x35f   : > { %v893_v42 = vsel %vm2750_vm3, %v892_v37, %v891_v62  ;;  %v2325_v62 = vsub.f32 %v2127_v46, %v2225_v27  ;;  %v638_v37 = vmul.f32 1.442695, %v2330_v5 }
 0x360   : > { %v904_v14 = vsel %vm2745_vm8, %v893_v42, %v903_v54 }
 0x361   : > { %v628_v16 = vmul.f32 1.442695, %v2325_v62 }
 0x363   : > { %1786 = vpow2.f32 %v628_v16 }
 0x364   : > { %v869_v50 = vpop.permute.xlu1 %868  ;;  %1788 = vpow2.f32 %v638_v37 }
 0x365   : > { %v895_v44 = vperm.slane %v869_v50, %v2149_v57  ;;  %1790 = vpow2.f32 %v644_v28  ;;  %v2340_v50 = vsub.f32 %v2142_v55, %v2211_v10  ;;  %v668_v55 = vpop.permute.xlu2 %667 }
 0x367   : > { %v896_v35 = vsel %vm2750_vm3, %v895_v44, %v894_v0  ;;  %v632_v17 = vmul.f32 1.442695, %v2340_v50  ;;  %v640_v0 = vmul.f32 1.442695, %v2345_v63  ;;  %v2350_v44 = vsub.f32 %v2195_v29, %v2223_v24 }
 0x368   : > { %v905_v4 = vsel %vm2744_vm9, %v896_v35, %v904_v14 }
 0x369   : > { %v906_v9 = vsel %vm2743_vm10, %v899_v20, %v905_v4  ;;  %v1787_v39 = vpop.eup %1786  ;;  %1792 = vpow2.f32 %v632_v17  ;;  %2759 = vst [vmem:[#allocation8_spill] sm:$0xff] %v2350_v44  ;;  %v646_v19 = vmul.f32 1.442695, %v2350_v44 }
 0x36a   : > { %v907_v47 = vsel %vm2742_vm11, %v906_v9, 2147483647  ;;  %v1789_v46 = vpop.eup %1788  ;;  %1794 = vpow2.f32 %v640_v0 }
 0x36b   : > { %v909_v22 = vshra.s32 %v907_v47, 16  ;;  %v1791_v27 = vpop.eup %1790  ;;  %v908_v43 = vand.u32 65535, %v907_v47  ;;  %1796 = vpow2.f32 %v646_v19 }
 0x36d   : > { %v911_v23 = vcvt.s32.f32 %v909_v22  ;;  %v910_v58 = vcvt.s32.f32 %v908_v43  ;;  %v671_v14 = vpop.permute.xlu2 %670  ;;  %v714_v43 = vperm.slane %v668_v55, %v2138_v51 }
 0x36f   : > { %912 = vmin.xlane.f32.xlu1 %v911_v23  ;;  %v1793_v11 = vpop.eup %1792 }
 0x370   : > { %v1795_v10 = vpop.eup %1794 }
 0x371   : > { %v1797_v54 = vpop.eup %1796 }
 0x375   : > { %v674_v60 = vpop.permute.xlu2 %673 }
 0x376   : > { %v717_v28 = vperm.slane %v674_v60, %v2138_v51 }
 0x37d   : > { %v677_v18 = vpop.permute.xlu2 %676 }
 0x37e   : > { %v718_v24 = vperm.slane %v677_v18, %v2149_v57 }
 0x385   : > { %v680_v35 = vpop.permute.xlu2 %679 }
 0x388   : > { %682 = vperm.xlu1 %1763, %v1787_v39   ;;  %v715_v39 = vperm.slane %v671_v14, %v2149_v57 }
 0x38d   : > { %v2353_v20 = vpop.permute.xlu2 %685 }
 0x390   : > { %697 = vperm.xlu1 %1763, %v1789_v46   ;;  %v720_v46 = vperm.slane %v680_v35, %v2138_v51 }
 0x395   : > { %v692_v4 = vpop.permute.xlu2 %691 }
 0x398   : > { %706 = vperm.xlu1 %1763, %v1791_v27  }
 0x39d   : > { %v695_v47 = vpop.permute.xlu2 %694 }
 0x39e   : > { %v727_v27 = vperm.slane %v695_v47, %v2149_v57 }
 0x3a5   : > { %v704_v29 = vpop.permute.xlu2 %703 }
 0x3a6   : > { %v732_v14 = vperm.slane %v704_v29, %v2138_v51 }
 0x3ad   : > { %v2367_v0 = vpop.permute.xlu2 %712 }
 0x3e2   : > { %v913_v38 = vpop.xlane.xlu1 %912 }
 0x3e3   : > { %vm914_vm2 = vcmp.eq.f32.partialorder %v911_v23, %v913_v38  ;;  %v919_v23 = vcvt.f32.s32 %v913_v38  ;;  %v726_v38 = vperm.slane %v692_v4, %v2138_v51 }
 0x3e4   : > { %v915_v42 = vsel %vm914_vm2, %v910_v58, inf  ;;  %v719_v58 = vsel %vm2750_vm3, %v718_v24, %v717_v28  ;;  %v1701_v24 = vld [vmem:[%s2735_s2 + $0x90] sm:$0xff] }
 0x3e5   : > { %916 = vmin.xlane.f32.xlu0 %v915_v42  ;;  %v2376_v18 = vsel %vm2750_vm3, %v727_v27, %v726_v38  ;;  %1119 = vmatpush.bf16.msra.mxu3 %v1701_v24 }
 0x3f9   : > { %688 = vperm.xlu0 %1765, %v1793_v11   ;;  %v920_v11 = vshll.u32 %v919_v23, 16 }
 0x3fa   : > { %v683_v9 = vpop.permute.xlu1 %682 }
 0x3fb   : > { %v721_v16 = vperm.slane %v683_v9, %v2149_v57 }
 0x3fd   : > { %v722_v19 = vsel %vm2750_vm3, %v721_v16, %v720_v46 }
 0x401   : > { %700 = vperm.xlu0 %1765, %v1795_v10  }
 0x402   : > { %v2355_v22 = vpop.permute.xlu1 %697 }
 0x409   : > { %709 = vperm.xlu0 %1765, %v1797_v54   ;;  %v716_v54 = vsel %vm2750_vm3, %v715_v39, %v714_v43 }
 0x40a   : > { %v707_v37 = vpop.permute.xlu1 %706  ;;  %v738_v60 = vsel %vm2748_vm4, %v719_v58, %v716_v54 }
 0x40b   : > { %v733_v42 = vperm.slane %v707_v37, %v2149_v57  ;;  %v2381_v9 = vsel %vm2747_vm5, %v722_v19, %v738_v60 }
 0x40d   : > { %v2386_v29 = vsel %vm2750_vm3, %v733_v42, %v732_v14 }
 0x458   : > { %v917_v17 = vpop.xlane.xlu0 %916 }
 0x459   : > { %v918_v10 = vcvt.f32.s32 %v917_v17 }
 0x45b   : > { %v921_v35 = vadd.s32 %v920_v11, %v918_v10 }
 0x45d   : > { %v925_v23 = vperm.slane %v921_v35, 0  ;;  %v926_v16 = vperm.slane %v921_v35, 1  ;;  %v927_v37 = vperm.slane %v921_v35, 2  ;;  %v928_v39 = vperm.slane %v921_v35, 3 }
 0x45e   : > { %v929_v28 = vperm.slane %v921_v35, 4  ;;  %v930_v46 = vperm.slane %v921_v35, 5  ;;  %v931_v27 = vperm.slane %v921_v35, 6  ;;  %v932_v43 = vperm.slane %v921_v35, 7 }
 0x45f   : > { %vm2392_vm15 = vcmp.eq.s32.totalorder %v2125_v45, %v925_v23  ;;  %vm2397_vm12 = vcmp.eq.s32.totalorder %v2132_v48, %v925_v23  ;;  %vm2402_vm13 = vcmp.eq.s32.totalorder %v2125_v45, %v926_v16  ;;  %vm2407_vm14 = vcmp.eq.s32.totalorder %v2132_v48, %v926_v16 }
 0x460   : > { %vm2412_vm0 = vcmp.eq.s32.totalorder %v2125_v45, %v927_v37  ;;  %vm2417_vm2 = vcmp.eq.s32.totalorder %v2132_v48, %v927_v37  ;;  %vm2422_vm11 = vcmp.eq.s32.totalorder %v2125_v45, %v928_v39  ;;  %vm2427_vm10 = vcmp.eq.s32.totalorder %v2132_v48, %v928_v39 }
 0x461   : > { %vm2432_vm9 = vcmp.eq.s32.totalorder %v2125_v45, %v929_v28  ;;  %vm2437_vm8 = vcmp.eq.s32.totalorder %v2132_v48, %v929_v28  ;;  %vm2442_vm7 = vcmp.eq.s32.totalorder %v2125_v45, %v930_v46  ;;  %vm2447_vm5 = vcmp.eq.s32.totalorder %v2132_v48, %v930_v46 }
 0x462   : > { %vm2452_vm4 = vcmp.eq.s32.totalorder %v2125_v45, %v931_v27  ;;  %vm2457_vm6 = vcmp.eq.s32.totalorder %v2132_v48, %v931_v27  ;;  %vm2462_vm3 = vcmp.eq.s32.totalorder %v2125_v45, %v932_v43  ;;  %vm2467_vm1 = vcmp.eq.s32.totalorder %v2132_v48, %v932_v43 }
 0x463   : > { %v1869_v28 = vmov 0.0  }
 0x464   : > { %v1593_v46 = vsel %vm2392_vm15, 1.0, %v1869_v28  ;;  %v1594_v27 = vsel %vm2397_vm12, 1.0, %v1869_v28  ;;  %v1595_v4 = vsel %vm2402_vm13, 1.0, %v1869_v28  ;;  %v1596_v45 = vsel %vm2407_vm14, 1.0, %v1869_v28 }
 0x465   : > { %v1597_v47 = vsel %vm2412_vm0, 1.0, %v1869_v28  ;;  %v1598_v48 = vsel %vm2417_vm2, 1.0, %v1869_v28  ;;  %v1599_v43 = vsel %vm2422_vm11, 1.0, %v1869_v28  ;;  %v1600_v58 = vsel %vm2427_vm10, 1.0, %v1869_v28 }
 0x466   : > { %v1601_v42 = vsel %vm2432_vm9, 1.0, %v1869_v28  ;;  %v1602_v17 = vsel %vm2437_vm8, 1.0, %v1869_v28  ;;  %v1603_v38 = vsel %vm2442_vm7, 1.0, %v1869_v28  ;;  %v1604_v11 = vsel %vm2447_vm5, 1.0, %v1869_v28 }
 0x467   : > { %v1605_v19 = vsel %vm2452_vm4, 1.0, %v1869_v28  ;;  %v1606_v10 = vsel %vm2457_vm6, 1.0, %v1869_v28  ;;  %v1607_v54 = vsel %vm2462_vm3, 1.0, %v1869_v28  ;;  %v981_v14 = vmul.f32 %v1593_v46, %v2030_v36 }
 0x468   : > { %v982_v60 = vmul.f32 %v1594_v27, %v2046_v49  ;;  %v983_v55 = vmul.f32 %v1595_v4, %v2039_v41  ;;  %v984_v35 = vmul.f32 %v1596_v45, %v2054_v53  ;;  %v1608_v24 = vsel %vm2467_vm1, 1.0, %v1869_v28 }
 0x469   : > { %v985_v23 = vmul.f32 %v1597_v47, %v2036_v40  ;;  %v986_v44 = vmul.f32 %v1598_v48, %v2051_v52  ;;  %v987_v16 = vmul.f32 %v1599_v43, %v2063_v61  ;;  %v988_v37 = vmul.f32 %v1600_v58, %v2071_v2 }
 0x46a   : > { %v989_v63 = vmul.f32 %v1601_v42, %v2068_v1  ;;  %v990_v36 = vmul.f32 %v1602_v17, %v2079_v8  ;;  %v991_v49 = vmul.f32 %v1603_v38, %v2087_v13  ;;  %v992_v41 = vmul.f32 %v1604_v11, %v2084_v12  ;;  %v1709_v17 = vld [vmem:[%s2735_s2 + $0xd0] sm:$0xff] }
 0x46b   : > { %v993_v53 = vmul.f32 %v1605_v19, %v2096_v21  ;;  %v994_v4 = vmul.f32 %v1606_v10, %v2104_v26  ;;  %v995_v40 = vmul.f32 %v1607_v54, %v2101_v25  ;;  %v689_v47 = vpop.permute.xlu0 %688  ;;  %vm2792_vm1 = vcmask 130048   ;;  %1193 = vmatpush.bf16.msrb.mxu3 %v1709_v17 }
 0x46c   : > { %v997_v52 = vsel %vm2792_vm1, %v981_v14, 0.0  ;;  %vm2793_vm3 = vcmask 123904   ;;  %vm2794_vm4 = vmmov %vm2792_vm1  ;;  %v724_v8 = vperm.slane %v689_v47, %v2149_v57  ;;  %v996_v46 = vmul.f32 %v1608_v24, %v2111_v31  ;;  %v1708_v14 = vld [vmem:[%s2735_s2 + $0xc8] sm:$0xff] }
 0x46d   : > { %v998_v61 = vsel %vm2793_vm3, %v982_v60, 0.0  ;;  %v1006_v2 = vsel %vm2794_vm4, %v983_v55, 0.0  ;;  %vm2795_vm5 = vmmov %vm2793_vm3  ;;  %v2801_v48 = vperm.slane %v2353_v20, %v2138_v51  ;;  %vm2802_vm11 = vcmask 130112  }
 0x46e   : > { %v1007_v1 = vsel %vm2795_vm5, %v984_v35, 0.0  ;;  %v999_v13 = vadd.f32 %v998_v61, %v997_v52  ;;  %vm2796_vm6 = vmmov %vm2792_vm1  ;;  %vm2808_vm2 = vcmask 1043459   ;;  %v1060_v52 = vsel %vm2792_vm1, %v995_v40, 0.0 }
 0x46f   : > { %v1008_v39 = vadd.f32 %v1007_v1, %v1006_v2  ;;  %v1015_v12 = vsel %vm2796_vm6, %v985_v23, 0.0  ;;  %vm2797_vm7 = vmmov %vm2793_vm3  ;;  %v725_v43 = vsel %vm2802_vm11, %v724_v8, %v2801_v48  ;;  %1194 = vmatpush.bf16.msrb.mxu3 %v1708_v14  ;;  %vm2814_vm6 = vcmask 1041409  }
 0x470   : > { %v1016_v21 = vsel %vm2797_vm7, %v986_v44, 0.0  ;;  %vm2798_vm8 = vmmov %vm2792_vm1  ;;  %v1000_v27 = vrot.slane %v999_v13, 4 }
 0x471   : > { %v1024_v26 = vsel %vm2798_vm8, %v987_v16, 0.0  ;;  %vm2799_vm9 = vmmov %vm2793_vm3  ;;  %v1009_v55 = vrot.slane %v1008_v39, 4  ;;  %v1017_v45 = vadd.f32 %v1016_v21, %v1015_v12  ;;  %v2546_v16 = vsel %vm2808_vm2, %v725_v43, %v2381_v9 }
 0x472   : > { %v1025_v25 = vsel %vm2799_vm9, %v988_v37, 0.0  ;;  %vm2800_vm10 = vmmov %vm2792_vm1  ;;  %vm2816_vm8 = vcmask 1042434   ;;  %vm2817_vm9 = vcmask 1044484  }
 0x473   : > { %v1033_v28 = vsel %vm2800_vm10, %v989_v63, 0.0  ;;  %v1026_v58 = vadd.f32 %v1025_v25, %v1024_v26  ;;  %vm2803_vm15 = vmmov %vm2793_vm3  ;;  %v1001_v63 = vadd.f32 %v1000_v27, %v999_v13  ;;  %v1010_v38 = vadd.f32 %v1009_v55, %v1008_v39  ;;  %v701_v37 = vpop.permute.xlu0 %700  ;;  %v1707_v13 = vld [vmem:[%s2735_s2 + $0xc0] sm:$0xff] }
 0x474   : > { %v1034_v42 = vsel %vm2803_vm15, %v990_v36, 0.0  ;;  %vm2804_vm12 = vmmov %vm2792_vm1  ;;  %v1018_v31 = vrot.slane %v1017_v45, 4  ;;  %v730_v9 = vperm.slane %v701_v37, %v2149_v57  ;;  %1195 = vmatpush.bf16.msrb.mxu3 %v1707_v13 }
 0x475   : > { %v1042_v44 = vsel %vm2804_vm12, %v991_v49, 0.0  ;;  %v1035_v11 = vadd.f32 %v1034_v42, %v1033_v28  ;;  %v1027_v19 = vrot.slane %v1026_v58, 4  ;;  %vm2805_vm13 = vmmov %vm2793_vm3  ;;  %v1002_v60 = vrot.slane %v1001_v63, 2 }
 0x476   : > { %v1043_v10 = vsel %vm2805_vm13, %v992_v41, 0.0  ;;  %vm2806_vm14 = vmmov %vm2792_vm1  ;;  %v1011_v35 = vrot.slane %v1010_v38, 2  ;;  %v1019_v24 = vadd.f32 %v1018_v31, %v1017_v45  ;;  %vm2822_vm13 = vcmask 1046534  }
 0x477   : > { %v1051_v20 = vsel %vm2806_vm14, %v993_v53, 0.0  ;;  %vm2807_vm0 = vmmov %vm2793_vm3  ;;  %v1036_v23 = vrot.slane %v1035_v11, 4  ;;  %v1028_v36 = vadd.f32 %v1027_v19, %v1026_v58  ;;  %v1044_v49 = vadd.f32 %v1043_v10, %v1042_v44 }
 0x478   : > { %v1052_v54 = vsel %vm2807_vm0, %v994_v4, 0.0  ;;  %v1003_v53 = vadd.f32 %v1002_v60, %v1001_v63  ;;  %v1012_v47 = vadd.f32 %v1011_v35, %v1010_v38  ;;  %v1020_v4 = vrot.slane %v1019_v24, 2  ;;  %vm2809_vm3 = vmmov %vm2807_vm0 }
 0x479   : > { %v1053_v41 = vadd.f32 %v1052_v54, %v1051_v20  ;;  %v1029_v61 = vrot.slane %v1028_v36, 2  ;;  %v1037_v2 = vadd.f32 %v1036_v23, %v1035_v11  ;;  %v1045_v1 = vrot.slane %v1044_v49, 4  ;;  %vm2811_vm4 = vmmov %vm2802_vm11 }
 0x47a   : > { %v1004_v39 = vrot.slane %v1003_v53, 1  ;;  %v1013_v12 = vrot.slane %v1012_v47, 1  ;;  %v1021_v21 = vadd.f32 %v1020_v4, %v1019_v24  ;;  %v1061_v48 = vsel %vm2809_vm3, %v996_v46, 0.0  ;;  %vm2813_vm5 = vmmov %vm2811_vm4 }
 0x47b   : > { %v1054_v8 = vrot.slane %v1053_v41, 4  ;;  %v1030_v26 = vadd.f32 %v1029_v61, %v1028_v36  ;;  %v1038_v25 = vrot.slane %v1037_v2, 2  ;;  %v1046_v28 = vadd.f32 %v1045_v1, %v1044_v49  ;;  %v710_v11 = vpop.permute.xlu0 %709  ;;  %vm2815_vm7 = vmmov %vm2814_vm6 }
 0x47c   : > { %v1005_v55 = vadd.f32 %v1004_v39, %v1003_v53  ;;  %v1014_v40 = vadd.f32 %v1013_v12, %v1012_v47  ;;  %v1022_v45 = vrot.slane %v1021_v21, 1  ;;  %v1062_v63 = vadd.f32 %v1061_v48, %v1060_v52  ;;  %vm2818_vm10 = vmmov %vm2808_vm2 }
 0x47d   : > { %v1055_v27 = vadd.f32 %v1054_v8, %v1053_v41  ;;  %v1031_v43 = vrot.slane %v1030_v26, 1  ;;  %v1039_v58 = vadd.f32 %v1038_v25, %v1037_v2  ;;  %v1047_v42 = vrot.slane %v1046_v28, 2  ;;  %vm2820_vm15 = vmmov %vm2816_vm8 }
 0x47e   : > { %v1023_v17 = vadd.f32 %v1022_v45, %v1021_v21  ;;  %v1069_v38 = vpack.c.bf16 %v1005_v55, %v1005_v55  ;;  %v1070_v31 = vpack.c.bf16 %v1014_v40, %v1014_v40  ;;  %v735_v14 = vperm.slane %v710_v11, %v2138_v51  ;;  %vm2821_vm12 = vmmov %vm2817_vm9 }
 0x47f   : > { %v1056_v44 = vrot.slane %v1055_v27, 2  ;;  %v1032_v19 = vadd.f32 %v1031_v43, %v1030_v26  ;;  %v1040_v10 = vrot.slane %v1039_v58, 1  ;;  %v1048_v20 = vadd.f32 %v1047_v42, %v1046_v28  ;;  %vm2824_vm0 = vmmov %vm2808_vm2 }
 0x480   : > { %v1063_v60 = vrot.slane %v1062_v63, 4  ;;  %v1071_v35 = vpack.c.bf16 %v1023_v17, %v1023_v17  ;;  %v1087_v24 = vunpack.c.l.b16 %v1069_v38  ;;  %v2810_v49 = vperm.slane %v2355_v22, %v2138_v51  ;;  %vm2826_vm1 = vmmov %vm2817_vm9 }
 0x481   : > { %v1057_v54 = vadd.f32 %v1056_v44, %v1055_v27  ;;  %v1041_v46 = vadd.f32 %v1040_v10, %v1039_v58  ;;  %v1049_v23 = vrot.slane %v1048_v20, 1  ;;  %v1072_v36 = vpack.c.bf16 %v1032_v19, %v1032_v19 }
 0x482   : > { %v731_v41 = vsel %vm2811_vm4, %v730_v9, %v2810_v49  ;;  %v1064_v53 = vadd.f32 %v1063_v60, %v1062_v63  ;;  %v1088_v47 = vunpack.c.l.b16 %v1070_v31  ;;  %v1089_v4 = vunpack.c.l.b16 %v1071_v35  ;;  %v1706_v60 = vld [vmem:[%s2735_s2 + $0xb8] sm:$0xff]  ;;  %v1705_v35 = vld [vmem:[%s2735_s2 + $0xb0] sm:$0xff] }
 0x483   : > { %v1058_v37 = vrot.slane %v1057_v54, 1  ;;  %v1050_v52 = vadd.f32 %v1049_v23, %v1048_v20  ;;  %v1073_v2 = vpack.c.bf16 %v1041_v46, %v1041_v46  ;;  %v2812_v1 = vperm.slane %v2367_v0, %v2149_v57  ;;  %1196 = vmatpush.bf16.msrb.mxu3 %v1706_v60 }
 0x484   : > { %v1065_v13 = vrot.slane %v1064_v53, 2  ;;  %v1090_v39 = vunpack.c.l.b16 %v1072_v36  ;;  %v1095_v12 = vsel %vm2814_vm6, %v1088_v47, %v1087_v24  ;;  %v1404_v21 = vsel %vm2815_vm7, %v1014_v40, %v1005_v55  ;;  %v1704_v24 = vld [vmem:[%s2735_s2 + $0xa8] sm:$0xff] }
 0x485   : > { %v1059_v61 = vadd.f32 %v1058_v37, %v1057_v54  ;;  %v737_v8 = vsel %vm2813_vm5, %v2812_v1, %v735_v14  ;;  %v1074_v22 = vpack.c.bf16 %v1050_v52, %v1050_v52  ;;  %v1091_v26 = vunpack.c.l.b16 %v1073_v2  ;;  %vm2829_vm5 = vmmov %vm2822_vm13  ;;  %v1702_v37 = vld [vmem:[%s2735_s2 + $0x98] sm:$0xff] }
 0x486   : > { %v1096_v9 = vsel %vm2816_vm8, %v1089_v4, %v1095_v12  ;;  %v741_v25 = vsel %vm2817_vm9, %v2376_v18, %v2546_v16  ;;  %v1066_v28 = vadd.f32 %v1065_v13, %v1064_v53  ;;  %vm2819_vm11 = vcmask 1045509   ;;  %vm2831_vm7 = vmmov %vm2829_vm5 }
 0x487   : > { %v1097_v27 = vsel %vm2818_vm10, %v1090_v39, %v1096_v9  ;;  %v742_v0 = vsel %vm2819_vm11, %v731_v41, %v741_v25  ;;  %v1405_v45 = vsel %vm2820_vm15, %v1023_v17, %v1404_v21  ;;  %v1075_v48 = vpack.c.bf16 %v1059_v61, %v1059_v61  ;;  %vm2827_vm3 = vmmov %vm2819_vm11  ;;  %1197 = vmatpush.bf16.msrb.mxu3 %v1705_v35  ;;  %v1713_v9 = vld [vmem:[%s2735_s2 + $0xf0] sm:$0xff]  ;;  %v1712_v25 = vld [vmem:[%s2735_s2 + $0xe8] sm:$0xff] }
 0x488   : > { %v1098_v43 = vsel %vm2821_vm12, %v1091_v26, %v1097_v27  ;;  %v743_v55 = vsel %vm2822_vm13, %v2386_v29, %v742_v0  ;;  %v1067_v40 = vrot.slane %v1066_v28, 1  ;;  %v1092_v58 = vunpack.c.l.b16 %v1074_v22  ;;  %vm2828_vm4 = vmmov %vm2827_vm3  ;;  %v1710_v27 = vld [vmem:[%s2735_s2 + $0xd8] sm:$0xff] }
 0x489   : > { %vm2823_vm14 = vcmask 1047559   ;;  %v1406_v44 = vsel %vm2824_vm0, %v1032_v19, %v1405_v45  ;;  %vm2825_vm2 = vcmask 80896   ;;  %v1093_v31 = vunpack.c.l.b16 %v1075_v48  ;;  %v1144_v0 = vld [vmem:[%s2736_s3 + $0x18] sm:$0xff] }
 0x48a   : > { %v744_v42 = vsel %vm2823_vm14, %v737_v8, %v743_v55  ;;  %v1407_v16 = vsel %vm2826_vm1, %v1041_v46, %v1406_v44  ;;  %v1068_v63 = vadd.f32 %v1067_v40, %v1066_v28  ;;  %v1099_v38 = vsel %vm2827_vm3, %v1092_v58, %v1098_v43  ;;  %vm2830_vm6 = vmmov %vm2823_vm14  ;;  %v1703_v46 = vld [vmem:[%s2735_s2 + $0xa0] sm:$0xff] }
 0x48b   : > { %v746_v18 = vsel %vm2825_vm2, %v744_v42, 0.0  ;;  %v1408_v17 = vsel %vm2828_vm4, %v1050_v52, %v1407_v16  ;;  %v1100_v20 = vsel %vm2831_vm7, %v1093_v31, %v1099_v38  ;;  %vm2832_vm8 = vmmov %vm2830_vm6  ;;  %vm2833_vm9 = vcmask 130048   ;;  %1198 = vmatpush.bf16.msrb.mxu3 %v1704_v24  ;;  %v1711_v28 = vld [vmem:[%s2735_s2 + $0xe0] sm:$0xff]  ;;  %v2834_v38 = vld [vmem:[#allocation5_spill] sm:$0xff] }
 0x48c   : > { %747 = vadd.xlane.f32.xlu0 %v746_v18  ;;  %v1409_v11 = vsel %vm2829_vm5, %v1059_v61, %v1408_v17  ;;  %v1076_v29 = vpack.c.bf16 %v1068_v63, %v1068_v63  ;;  %v1224_v58 = vld [vmem:[%s2736_s3 + $0x20] sm:$0xff]  ;;  %vm1287_vm10 = vcmask 64512   ;;  %v2835_v31 = vld [vmem:[#allocation6_spill] sm:$0xff]  ;;  %vm2836_vm11 = vcmask 130112  }
 0x48d   : > { %v2583_v10 = vsel %vm2830_vm6, %v1068_v63, %v1409_v11  ;;  %vm2837_vm15 = vmmov %vm2836_vm11  ;;  %vm2838_vm12 = vcmask 1041409   ;;  %vm2841_vm14 = vcmask 1042434   ;;  %vm2844_vm2 = vcmask 1043459  }
 0x48e   : > { %v1094_v19 = vunpack.c.l.b16 %v1076_v29  ;;  %vm2839_vm13 = vmmov %vm2836_vm11  ;;  %vm2847_vm4 = vcmask 1044484   ;;  %vm2848_vm5 = vcmask 1045509  }
 0x48f   : > { %1199 = vmatpush.bf16.msrb.mxu3 %v1703_v46  ;;  %vm2843_vm0 = vmmov %vm2836_vm11 }
 0x490   : > { %v1101_v54 = vsel %vm2832_vm8, %v1094_v19, %v1100_v20  ;;  %vm2845_vm1 = vmmov %vm2843_vm0  ;;  %vm2851_vm8 = vcmask 1046534  }
 0x491   : > { %v1102_v14 = vpack.c.b16 %v1101_v54, %v1101_v54  ;;  %vm2846_vm3 = vmmov %vm2843_vm0 }
 0x492   : > { %vm2849_vm6 = vmmov %vm2843_vm0 }
 0x493   : > { %1613 = vmatmul.msk.bf16.vlgmr.msra.gmra.mxu3 %vm2833_vm9, %v1102_v14  ;;  %vm2850_vm7 = vmmov %vm2843_vm0  ;;  %vm2852_vm9 = vcmask 1047559  }
 0x494   : > { %1200 = vmatpush.bf16.msrb.mxu3 %v1702_v37 }
 0x4ff   : > { %v748_v23 = vpop.xlane.xlu0 %747 }
 0x500   : > { %1798 = vlog2.f32 %v748_v23 }
 0x506   : > { %v1799_v36 = vpop.eup %1798 }
 0x507   : > { %v2603_v49 = vmul.f32 0.6931472, %v1799_v36 }
 0x509   : > { %v753_v41 = vperm.slane %v2603_v49, 1  ;;  %v752_v53 = vperm.slane %v2603_v49, 0  ;;  %v754_v52 = vperm.slane %v2603_v49, 2  ;;  %v756_v1 = vperm.slane %v2603_v49, 4 }
 0x50a   : > { %v755_v8 = vperm.slane %v2603_v49, 3  ;;  %v758_v22 = vperm.slane %v2603_v49, 6  ;;  %v757_v20 = vperm.slane %v2603_v49, 5 }
 0x50b   : > { %v770_v47 = vsub.f32 %v2256_v6, %v753_v41  ;;  %v769_v4 = vsub.f32 %v2252_v15, %v752_v53  ;;  %v773_v61 = vsub.f32 %v2325_v62, %v754_v52  ;;  %v771_v2 = vsub.f32 %v2260_v7, %v753_v41 }
 0x50c   : > { %v776_v15 = vsub.f32 %v2274_v32, %v756_v1  ;;  %v774_v12 = vsub.f32 %v2270_v30, %v755_v8  ;;  %v777_v7 = vsub.f32 %v2278_v59, %v756_v1  ;;  %v780_v26 = vsub.f32 %v2283_v3, %v758_v22  ;;  %v1717_v30 = vld [vmem:[%s2735_s2 + $0x110] sm:$0xff]  ;;  %v1716_v59 = vld [vmem:[%s2735_s2 + $0x108] sm:$0xff]  ;;  %v1715_v3 = vld [vmem:[%s2735_s2 + $0x100] sm:$0xff] }
 0x50d   : > { %1323 = vperm.xlu2 %1764, %v770_v47   ;;  %1320 = vperm.xlu0 %1765, %v769_v4   ;;  %v768_v17 = vsub.f32 %v2834_v38, %v752_v53  ;;  %v772_v11 = vsub.f32 %v2835_v31, %v754_v52  ;;  %v775_v29 = vsub.f32 %v2340_v50, %v755_v8 }
 0x50e   : > { %1273 = vmatpush.bf16.msrb.mxu0 %v1717_v30  ;;  %v778_v19 = vsub.f32 %v2330_v5, %v757_v20  ;;  %v781_v54 = vsub.f32 %v2335_v33, %v758_v22 }
 0x512   : > { %1274 = vmatpush.bf16.msrb.mxu0 %v1716_v59 }
 0x515   : > { %1332 = vperm.xlu2 %1764, %v773_v61   ;;  %1326 = vperm.xlu0 %1765, %v771_v2  }
 0x516   : > { %v1121_v13 = vpop.f32.mrf.mxu3  ;;  %1275 = vmatpush.bf16.msrb.mxu0 %v1715_v3 }
 0x517   : > { %v1125_v39 = vadd.f32 %v1121_v13, %v2019_v34  ;;  %v759_v34 = vperm.slane %v2603_v49, 7  ;;  %v2840_v13 = vld [vmem:[#allocation7_spill] sm:$0xff] }
 0x519   : > { %v1126_v6 = vmax.f32 %v1125_v39, 0.0  ;;  %v783_v32 = vsub.f32 %v2288_v56, %v759_v34  ;;  %v1714_v56 = vld [vmem:[%s2735_s2 + $0xf8] sm:$0xff]  ;;  %v779_v39 = vsub.f32 %v2840_v13, %v757_v20 }
 0x51a   : > { %1276 = vmatpush.bf16.msrb.mxu0 %v1714_v56 }
 0x51b   : > { %v1127_v21 = vpack.c.bf16 %v1126_v6, %v1126_v6 }
 0x51d   : > { %1341 = vperm.xlu2 %1764, %v776_v15   ;;  %1335 = vperm.xlu0 %1765, %v774_v12   ;;  %v2842_v15 = vld [vmem:[#allocation8_spill] sm:$0xff] }
 0x51e   : > { %1201 = vmatmul.bf16.vlgmr.msrb.gmra.mxu3 %v1127_v21  ;;  %v1123_v62 = vpop.f32.mrf.mxu3  ;;  %1277 = vmatpush.bf16.msrb.mxu0 %v1713_v9  ;;  %v782_v12 = vsub.f32 %v2842_v15, %v759_v34 }
 0x522   : > { %1278 = vmatpush.bf16.msrb.mxu0 %v1712_v25 }
 0x525   : > { %1344 = vperm.xlu0 %1765, %v777_v7  }
 0x526   : > { %1279 = vmatpush.bf16.msrb.mxu0 %v1711_v28 }
 0x52a   : > { %1280 = vmatpush.bf16.msrb.mxu0 %v1710_v27 }
 0x52d   : > { %1353 = vperm.xlu0 %1765, %v780_v26  }
 0x535   : > { %1362 = vperm.xlu0 %1765, %v783_v32  }
 0x567   : > { %v1324_v23 = vpop.permute.xlu2 %1323 }
 0x56f   : > { %v1333_v41 = vpop.permute.xlu2 %1332 }
 0x570   : > { %v1371_v52 = vperm.slane %v1333_v41, %v2149_v57 }
 0x577   : > { %v1342_v21 = vpop.permute.xlu2 %1341 }
 0x57f   : > { %v1321_v50 = vpop.permute.xlu0 %1320 }
 0x580   : > { %v1365_v33 = vperm.slane %v1321_v50, %v2149_v57 }
 0x587   : > { %v1327_v36 = vpop.permute.xlu0 %1326 }
 0x588   : > { %v1368_v53 = vperm.slane %v1327_v36, %v2149_v57 }
 0x58f   : > { %v1336_v32 = vpop.permute.xlu0 %1335 }
 0x590   : > { %v1373_v49 = vperm.slane %v1336_v32, %v2138_v51 }
 0x597   : > { %v1345_v59 = vpop.permute.xlu0 %1344 }
 0x598   : > { %v1377_v27 = vperm.slane %v1345_v59, %v2149_v57 }
 0x59f   : > { %v1354_v9 = vpop.permute.xlu0 %1353 }
 0x5a0   : > { %v1382_v38 = vperm.slane %v1354_v9, %v2138_v51 }
 0x5a1   : > { %v1202_v45 = vpop.f32.mrf.mxu3 }
 0x5a2   : > { %v1203_v48 = vadd.f32 %v1202_v45, %v1144_v0 }
 0x5a4   : > { %v1206_v43 = vmax.f32 %v1203_v48, 0.0 }
 0x5a6   : > { %v1207_v55 = vpack.c.bf16 %v1206_v43, %v1206_v43  ;;  %v1376_v43 = vperm.slane %v1342_v21, %v2138_v51 }
 0x5a8   : > { %1281 = vmatmul.bf16.vlgmr.msrb.gmra.mxu0 %v1207_v55  ;;  %v1363_v55 = vpop.permute.xlu0 %1362 }
 0x5a9   : > { %v1204_v40 = vpop.f32.mrf.mxu3 }
 0x625   : > { %v1282_v42 = vpop.f32.mrf.mxu0 }
 0x626   : > { %v1283_v44 = vadd.f32 %v1282_v42, %v1224_v58 }
 0x628   : > { %v1286_v18 = vmax.f32 %v1283_v44, 0.0  ;;  %v1378_v44 = vsel %vm2846_vm3, %v1377_v27, %v1376_v43 }
 0x62a   : > { %v1288_v16 = vsel %vm1287_vm10, %v1286_v18, -inf }
 0x62b   : > { %1289 = vmax.xlane.f32.xlu1 %v1288_v16  ;;  %v1386_v16 = vperm.slane %v1363_v55, %v2149_v57 }
 0x62d   : > { %v1284_v63 = vpop.f32.mrf.mxu0 }
 0x644   : > { %1317 = vperm.xlu1 %1763, %v768_v17  }
 0x64c   : > { %1329 = vperm.xlu1 %1763, %v772_v11  }
 0x654   : > { %1338 = vperm.xlu1 %1763, %v775_v29  }
 0x65c   : > { %1347 = vperm.xlu1 %1763, %v778_v19  }
 0x664   : > { %1356 = vperm.xlu1 %1763, %v781_v54  }
 0x66c   : > { %1411 = vrot.lane.b32.xlu1 %v2583_v10, %s1870_s6  ;;  %v1367_v10 = vperm.slane %v1324_v23, %v2138_v51 }
 0x66e   : > { %v1369_v2 = vsel %vm2837_vm15, %v1368_v53, %v1367_v10  ;;  %vm2854_vm15 = vcmask 130048  }
 0x69e   : > { %v1290_v14 = vpop.xlane.xlu1 %1289 }
 0x69f   : > { %v1291_v60 = vsub.f32 %v1286_v18, %v1290_v14 }
 0x6a1   : > { %v1292_v35 = vmul.f32 1.442695, %v1291_v60 }
 0x6a3   : > { %1800 = vpow2.f32 %v1292_v35 }
 0x6a9   : > { %v1801_v24 = vpop.eup %1800 }
 0x6aa   : > { %v1294_v46 = vsel %vm1287_vm10, %v1801_v24, 0.0  ;;  %vm2853_vm10 = vcmask 80896  }
 0x6ab   : > { %1295 = vadd.xlane.f32.xlu2 %v1294_v46 }
 0x6b6   : > { %v1318_v37 = vpop.permute.xlu1 %1317 }
 0x6b7   : > { %v1364_v5 = vperm.slane %v1318_v37, %v2138_v51 }
 0x6b9   : > { %v1366_v47 = vsel %vm2836_vm11, %v1365_v33, %v1364_v5  ;;  %vm1421_vm11 = vcmask 326656  }
 0x6ba   : > { %v1388_v1 = vsel %vm2838_vm12, %v1369_v2, %v1366_v47  ;;  %vm2855_vm12 = vcmask 261120  }
 0x6be   : > { %v1330_v4 = vpop.permute.xlu1 %1329 }
 0x6bf   : > { %v1370_v61 = vperm.slane %v1330_v4, %v2138_v51 }
 0x6c1   : > { %v1372_v8 = vsel %vm2839_vm13, %v1371_v52, %v1370_v61 }
 0x6c2   : > { %v1389_v6 = vsel %vm2841_vm14, %v1372_v8, %v1388_v1 }
 0x6c3   : > { %1350 = vperm.xlu2 %1764, %v779_v39  }
 0x6c6   : > { %v1339_v30 = vpop.permute.xlu1 %1338 }
 0x6c7   : > { %v1374_v25 = vperm.slane %v1339_v30, %v2149_v57 }
 0x6c9   : > { %v1375_v34 = vsel %vm2843_vm0, %v1374_v25, %v1373_v49 }
 0x6ca   : > { %v1390_v40 = vsel %vm2844_vm2, %v1375_v34, %v1389_v6 }
 0x6cb   : > { %1359 = vperm.xlu2 %1764, %v782_v12   ;;  %v1391_v63 = vsel %vm2847_vm4, %v1378_v44, %v1390_v40 }
 0x6ce   : > { %v1348_v56 = vpop.permute.xlu1 %1347 }
 0x6cf   : > { %v1379_v45 = vperm.slane %v1348_v56, %v2138_v51 }
 0x6d6   : > { %v1357_v48 = vpop.permute.xlu1 %1356 }
 0x6d7   : > { %v1383_v18 = vperm.slane %v1357_v48, %v2149_v57 }
 0x6d9   : > { %v1384_v11 = vsel %vm2850_vm7, %v1383_v18, %v1382_v38 }
 0x71e   : > { %v1296_v62 = vpop.xlane.xlu2 %1295 }
 0x71f   : > { %1802 = vlog2.f32 %v1296_v62 }
 0x725   : > { %v1803_v7 = vpop.eup %1802 }
 0x726   : > { %v1298_v22 = vmul.f32 0.6931472, %v1803_v7  ;;  %v1351_v3 = vpop.permute.xlu2 %1350 }
 0x727   : > { %v1380_v28 = vperm.slane %v1351_v3, %v2149_v57 }
 0x728   : > { %v1299_v26 = vsub.f32 %v1291_v60, %v1298_v22 }
 0x729   : > { %v1381_v58 = vsel %vm2845_vm1, %v1380_v28, %v1379_v45 }
 0x72a   : > { %1415 = vrot.lane.b32.xlu2 %v1299_v26, %s1871_s7  ;;  %v1392_v17 = vsel %vm2848_vm5, %v1381_v58, %v1391_v63 }
 0x72b   : > { %v1393_v29 = vsel %vm2851_vm8, %v1384_v11, %v1392_v17 }
 0x72e   : > { %v1360_v0 = vpop.permute.xlu2 %1359 }
 0x72f   : > { %v1385_v42 = vperm.slane %v1360_v0, %v2138_v51  ;;  %v1412_v51 = vpop.permute.xlu1 %1411 }
 0x731   : > { %v1387_v31 = vsel %vm2849_vm6, %v1386_v16, %v1385_v42 }
 0x732   : > { %v1394_v20 = vsel %vm2852_vm9, %v1387_v31, %v1393_v29 }
 0x733   : > { %v1418_v57 = vsel %vm2853_vm10, %v1394_v20, 0.0 }
 0x734   : > { %v1419_v54 = vsel %vm2854_vm15, %v1418_v57, %v1412_v51 }
 0x784   : > { %v1416_v19 = vpop.permute.xlu2 %1415 }
 0x785   : > { %v1420_v14 = vsel %vm2855_vm12, %v1419_v54, %v1416_v19 }
 0x786   : > { %v1422_v60 = vsel %vm1421_vm11, %v1420_v14, 0.0 }
 0x787   : > { %1423 = vst [vmem:[%s206_s14] sm:$0xff] %v1422_v60 }
 0x788   : > { %1831 = shalt.err (!%p1828_p4)
}
 0x789   : > { %1718 = dma.vmem_to_hbm [thread:$0]  (%p1935_p5), %s1438_s20, 128, %s1440_s22, %s1425_s23  }
 0x78a PF: > { %p1724_p7 = scmp.ge.s32.totalorder %s1866_s18, 2  ;;  %s1451_s6 = sand.u32 1, %s1854_s15  }
 0x78b   : > { %s1452_s7 = scalar_lea.sflag [#allocation3], %s1451_s6 }
 0x78c   : > { %p1721_p8 = pnand %p1724_p7, %p1939_p6 }
 0x78e   : > { %p1722_p9 = pneg %p1721_p8 }
 0x790   : > { %1849 = dma.done.wait (%p1722_p9), %s1452_s7, 128  }
 0x791   : > { %1851 = vsyncadd (%p1722_p9), %s1452_s7, 4294967168  ;;  %p14_p10 = scmp.ge.s32.totalorder %s1922_s21, 4   ;;  %s2856_s15 = smov %s1858_s16 }
 0x792   : > { %s2857_s16 = smov %s1862_s17  ;;  %s2858_s17 = smov %s1933_s24 }
 0x793   : > { %s2859_s18 = smov %s1922_s21  ;;  %16 = sbr.rel (!%p14_p10) target bundleno = 3 (0x3), region = 74 }
 0x798   :  { %1458 = vsyncpa [#allocation3], 1 }
 0x799   :  { %1460 = vsyncpa [#allocation3 + $0x1], 1 }

</bundles_post_ra>
